<compile_context>
chip_gen: v6e
topology: v6e:2x2x1
jax: 0.10.0
libtpu: 0.0.40
codegen_flags: <defaults>
</compile_context>

<pallas_src>
import jax
import jax.numpy as jnp
from jax import lax
from jax.experimental import pallas as pl
from jax.experimental.pallas import tpu as pltpu


# ----------------------- module constants ---------------------------------
K = 7          # conv0 kernel size
S = 2          # conv0 stride
P = 3          # conv0 padding
COUT = 64      # conv0 output channels
C_FEAT = 1920  # densenet201 feature channels
FMAP = 7       # spatial size of the backbone feature map (7x7)
POOL = 4       # 4x4 avg-pool stub bridging conv0 (28x28) -> feature map (7x7)


# ---------------------------------------------------------------------------
# Kernel 1: conv0 (7x7 / stride 2 / pad 3 / no bias, 1 -> 64 ch) FUSED with
# the 4x4 average-pool stub, as one lane-dense matmul:
#   pooled[(n,ph), pw*64+c] = sum_k B[(n,ph), k] * Gp[k, pw*64+c]
# where B folds the oh-pool (sum of 4 overlapping 7-row windows) and Gp folds
# both the 7-tap sliding window over the output width and the ow-pool (1/16).
# ---------------------------------------------------------------------------
def _conv0_pool_kernel(xb_ref, g_ref, o_ref):
    o_ref[...] = jnp.dot(xb_ref[...], g_ref[...],
                         preferred_element_type=jnp.float32).astype(o_ref.dtype)


def _conv0_pool_gmatrix(w_oihw, wp, ow, kpad):
    """(K*Wp, (OW/4)*COUT) matrix: sliding window over output width AND the
    4-wide ow average pool (incl. the full 1/16 factor) folded into conv0's
    weights.  One-time transform."""
    cout = w_oihw.shape[0]
    w_t = jnp.transpose(w_oihw[:, 0], (1, 2, 0)).astype(jnp.float32)   # (K, K, Cout)
    iw = jnp.arange(wp)[:, None]                    # (Wp, 1)
    ows = jnp.arange(ow)[None, :]                   # (1, OW)
    kj = iw - S * ows                               # (Wp, OW)
    valid = (kj >= 0) & (kj < K)
    g = w_t[:, jnp.clip(kj, 0, K - 1), :]           # (K, Wp, OW, Cout)
    g = jnp.where(valid[None, :, :, None], g, 0.0)
    # fold the 4-wide ow pooling and the 1/(4*4) normalisation
    g = g.reshape(K, wp, ow // POOL, POOL, cout).sum(axis=3) / float(POOL * POOL)
    g = g.reshape(K * wp, (ow // POOL) * cout)      # (434, 448)
    g = jnp.pad(g, ((0, kpad - K * wp), (0, 0)))    # contraction dim -> 128-mult
    return g.astype(jnp.bfloat16)


def conv0_pool_pallas(x_nhwc, gpool, *, tb=256):
    """x_nhwc: (N, H, W, 1) f32 -> pooled conv0 features (N, 7, 7, 64) bf16."""
    N, H, W, _ = x_nhwc.shape
    OH = (H + 2 * P - K) // S + 1
    OW = (W + 2 * P - K) // S + 1
    Wp = W + 2 * P
    PH, PW = OH // POOL, OW // POOL
    assert OH % POOL == 0 and OW % POOL == 0 and PH == FMAP and PW == FMAP

    kdim = K * Wp
    kpad = pl.cdiv(kdim, 128) * 128                 # 434 -> 512
    cout = gpool.shape[1] // PW
    assert gpool.shape == (kpad, PW * cout)

    # Pooled row band (f32 sums, bf16 storage, ~0.43 MB):
    #   B[n, ph, ki, iw] = sum_{a<4} xpad[n, 8*ph + 2*a + ki, iw]
    # i.e. the oh-direction pool is folded into the band, so only 7 rows per
    # pooled output row reach HBM (vs. 28 per-output-row / 49x im2col before).
    # TODO(synk): build this band in-kernel (strided sublane reads of a whole
    # padded-image block) to remove even this small XLA pre-pass.
    xp = jnp.pad(x_nhwc[..., 0], ((0, 0), (P, P), (P, P)))            # (N, Hp, Wp) f32
    taps = []
    for ki in range(K):
        acc = None
        for a in range(POOL):
            st = ki + S * a
            sl = xp[:, st:st + (PH - 1) * S * POOL + 1:S * POOL, :]   # (N, PH, Wp)
            acc = sl if acc is None else acc + sl
        taps.append(acc)
    band = jnp.stack(taps, axis=2)                                    # (N, PH, K, Wp)
    xb = band.reshape(N * PH, kdim)

    rows = N * PH
    rows_pad = pl.cdiv(rows, tb) * tb
    xb = jnp.pad(xb, ((0, rows_pad - rows), (0, kpad - kdim))).astype(jnp.bfloat16)

    nblk = rows_pad // tb                           # 2 for 56x56 input: even -> v7x balanced
    out2 = pl.pallas_call(
        _conv0_pool_kernel,
        out_shape=jax.ShapeDtypeStruct((rows_pad, PW * cout), jnp.bfloat16),
        grid_spec=pltpu.PrefetchScalarGridSpec(
            num_scalar_prefetch=0,
            grid=(nblk,),
            in_specs=[pl.BlockSpec((tb, kpad), lambda i: (i, 0)),
                      pl.BlockSpec((kpad, PW * cout), lambda i: (0, 0))],
            out_specs=pl.BlockSpec((tb, PW * cout), lambda i: (i, 0))),
        compiler_params=pltpu.CompilerParams(
            dimension_semantics=("parallel",),
            vmem_limit_bytes=32 * 1024 * 1024),
    )(xb, gpool)
    return out2[:rows].reshape(N, PH, PW, cout)


# ---------------------------------------------------------------------------
# Kernel 2: fused head
#   (64->1920 backbone-projection stub) -> F.relu -> avg_pool2d(7) -> fc1
# One grid step handles ONE batch element (all 35 frames) via a fori_loop;
# the per-frame projection keeps the f32 intermediate at (64, 1920) ~ 0.5 MB.
# ---------------------------------------------------------------------------
def _head_kernel(y_ref, pw_ref, w1_ref, o_ref):
    # y_ref : (1, nfp, SPAD, 64) bf16 - all frames of one batch element
    # pw_ref: (64, 1920)         bf16 - projection weight (resident)
    # w1_ref: (nfp, 2, 1920)     bf16 - fc1 rows per frame
    # o_ref : (1, 1, 2)          f32  - logits (bias added in wrapper)
    nfp = y_ref.shape[1]
    inv_pool = 1.0 / float(FMAP * FMAP)

    def body(tt, acc):
        yf = y_ref[0, tt]                                             # (SPAD, 64)
        feat = jnp.dot(yf, pw_ref[...], preferred_element_type=jnp.float32)
        feat = jnp.maximum(feat, 0.0)                                 # F.relu (f32 math)
        pooled = jnp.sum(feat, axis=0, keepdims=True) * inv_pool      # avg_pool2d(7)
        w1 = w1_ref[tt].astype(jnp.float32)                           # (2, 1920)
        # fc1 partial as VPU multiply + lane reduce (no skinny MXU mat-vec).
        return acc + jnp.sum(pooled * w1, axis=1)[None, :]

    acc = lax.fori_loop(0, nfp, body, jnp.zeros((1, 2), jnp.float32))
    o_ref[...] = acc.reshape(o_ref.shape)


def head_pallas(y, proj_w_bf16, fc1_w_rows, bs, nfp, *, spad=64):
    """y: (bs*nfp, 7, 7, 64) bf16 -> (bs, 2) f32 (fc1 bias NOT included)."""
    n, fh, fw, c0 = y.shape
    assert n == bs * nfp and fh == FMAP and fw == FMAP

    # Zero-pad spatial 49 -> 64 (bf16 sublane multiple); padded rows project
    # to 0 and relu(0)=0, so they do not change the 7x7 pool sum.  The input
    # is already bf16 from the conv kernel -> no cast pass.
    yb = y.reshape(bs, nfp, fh * fw, c0)
    yb = jnp.pad(yb, ((0, 0), (0, 0), (0, spad - fh * fw), (0, 0)))   # (bs, nfp, 64, 64)

    c_feat = proj_w_bf16.shape[1]
    out = pl.pallas_call(
        _head_kernel,
        out_shape=jax.ShapeDtypeStruct((bs, 1, 2), jnp.float32),
        grid_spec=pltpu.PrefetchScalarGridSpec(
            num_scalar_prefetch=0,
            grid=(bs,),                               # one step per batch element
            in_specs=[
                pl.BlockSpec((1, nfp, spad, c0), lambda b: (b, 0, 0, 0)),
                pl.BlockSpec((c0, c_feat), lambda b: (0, 0)),
                pl.BlockSpec((nfp, 2, c_feat), lambda b: (0, 0, 0)),
            ],
            out_specs=pl.BlockSpec((1, 1, 2), lambda b: (b, 0, 0))),
        compiler_params=pltpu.CompilerParams(
            dimension_semantics=("parallel",),
            vmem_limit_bytes=32 * 1024 * 1024),
    )(yb, proj_w_bf16, fc1_w_rows)
    return out.reshape(bs, 2)


# ---------------------------------------------------------------------------
# Parameter re-layout (one-time) + model forward
# ---------------------------------------------------------------------------
def prepare_params(conv0_w, proj_w, fc1_w, fc1_b, h, w):
    Wp = w + 2 * P
    ow = (w + 2 * P - K) // S + 1
    kpad = pl.cdiv(K * Wp, 128) * 128
    c_feat = proj_w.shape[1]
    nfp = fc1_w.shape[1] // c_feat
    return dict(
        gpool=_conv0_pool_gmatrix(conv0_w, Wp, ow, kpad),              # (512, 448) bf16
        proj_w_bf16=proj_w.astype(jnp.bfloat16),                       # (64, 1920)
        fc1_w_rows=jnp.transpose(fc1_w.reshape(2, nfp, c_feat),
                                 (1, 0, 2)).astype(jnp.bfloat16),      # (nfp, 2, 1920)
        fc1_b=fc1_b.astype(jnp.float32),
    )


def spatial_model_forward(x5d, params):
    bs, f, p, h, w = x5d.shape
    nfp = f * p

    # input.view(bs*f*p, 1, h, w), NCHW -> NHWC
    x = x5d.reshape(bs * f * p, 1, h, w)
    x_nhwc = jnp.transpose(x, (0, 2, 3, 1))

    # base.features.conv0 + 4x4 avg-pool stub, fused into one Pallas matmul.
    # TODO(synk): densenet201 dense blocks / transitions / batch-norms are not
    # translated; the 4x4 pool (in this kernel) + 64->1920 channel projection
    # (fused into the head kernel) stand in for `base.features` after conv0.
    y = conv0_pool_pallas(x_nhwc, params["gpool"])                     # (N, 7, 7, 64) bf16

    # relu -> avg_pool2d(7) -> view(bs, -1) -> fc1 (Pallas, fused with the
    # 64->1920 projection).  Bias added once here, not per grid step.
    logits = head_pallas(y, params["proj_w_bf16"], params["fc1_w_rows"], bs, nfp)
    return logits + params["fc1_b"][None, :]


# ---------------------------------------------------------------------------
if __name__ == "__main__":
    key = jax.random.PRNGKey(0)
    k1, k2, k3, k4, k5 = jax.random.split(key, 5)

    # f*p = 35 so that fc1 in_features = 1920*35 matches the module definition.
    bs, f, p, h, w = 2, 5, 7, 56, 56

    x = jax.random.normal(k1, (bs, f, p, h, w), jnp.float32)
    conv0_w = jax.random.normal(k2, (COUT, 1, K, K), jnp.float32) * 0.1
    proj_w = jax.random.normal(k3, (COUT, C_FEAT), jnp.float32) * 0.05   # backbone stub
    fc1_w = jax.random.normal(k4, (2, C_FEAT * f * p), jnp.float32) * 0.01
    fc1_b = jax.random.normal(k5, (2,), jnp.float32)
    # note: fc2 (1920 -> 2) is declared in __init__ but unused in forward; omitted.

    params = prepare_params(conv0_w, proj_w, fc1_w, fc1_b, h, w)
    fwd = jax.jit(spatial_model_forward)
    out = jax.block_until_ready(fwd(x, params))

    # ---- pure-JAX f32 reference (kernels use bf16 storage -> looser tol) ----
    N = bs * f * p
    xr = jnp.transpose(x.reshape(N, 1, h, w), (0, 2, 3, 1))
    ref_conv = lax.conv_general_dilated(
        xr, jnp.transpose(conv0_w, (2, 3, 1, 0)),
        window_strides=(S, S), padding=((P, P), (P, P)),
        dimension_numbers=("NHWC", "HWIO", "NHWC"))
    _, OHr, OWr, _ = ref_conv.shape
    yr = ref_conv.reshape(N, FMAP, OHr // FMAP, FMAP, OWr // FMAP, COUT).mean(axis=(2, 4))
    featr = jnp.einsum("nhwc,cd->nhwd", yr, proj_w)
    pooled = jnp.mean(jnp.maximum(featr, 0.0), axis=(1, 2))
    ref = pooled.reshape(bs, f * p * C_FEAT) @ fc1_w.T + fc1_b

    assert out.shape == (bs, 2)
    assert jnp.allclose(out, ref, rtol=2e-2, atol=2e-2), (out, ref)
    print("KERNEL_OK")
</pallas_src>

<mosaic_0001>
module attributes {stable_mosaic.version = 11 : i64} {
  func.func @_conv0_pool_kernel(%arg0: i32, %arg1: memref<256x512xbf16, #tpu.memory_space<vmem>>, %arg2: memref<512x448xbf16, #tpu.memory_space<vmem>>, %arg3: memref<256x448xbf16, #tpu.memory_space<vmem>>) attributes {dimension_semantics = [#tpu.dimension_semantics<parallel>], iteration_bounds = array<i64: 2>, scalar_prefetch = 0 : i64, scratch_operands = 0 : i64, tpu.core_type = #tpu.core_type<tc>, window_params = [{transform_indices = @transform_0, window_bounds = array<i64: 256, 512>}, {pipeline_mode = #tpu.pipeline_mode<synchronous>, transform_indices = @transform_1, window_bounds = array<i64: 512, 448>}, {transform_indices = @transform_2, window_bounds = array<i64: 256, 448>}]} {
    %c0 = arith.constant 0 : index
    %c0_0 = arith.constant 0 : index
    %0 = vector.load %arg1[%c0, %c0_0] : memref<256x512xbf16, #tpu.memory_space<vmem>>, vector<256x512xbf16>
    %c0_1 = arith.constant 0 : index
    %c0_2 = arith.constant 0 : index
    %1 = vector.load %arg2[%c0_1, %c0_2] : memref<512x448xbf16, #tpu.memory_space<vmem>>, vector<512x448xbf16>
    %cst = arith.constant dense<0.000000e+00> : vector<256x448xf32>
    %2 = tpu.matmul %0, %1, %cst {dimension_numbers = #tpu.dot_dimension_numbers<[1], [0], [0], [1], [0, 0, 1, 1], [], []>} : vector<256x512xbf16>, vector<512x448xbf16>, vector<256x448xf32> -> vector<256x448xf32>
    %3 = arith.truncf %2 : vector<256x448xf32> to vector<256x448xbf16>
    %c0_3 = arith.constant 0 : index
    %c0_4 = arith.constant 0 : index
    %4 = vector.load %arg3[%c0_3, %c0_4] : memref<256x448xbf16, #tpu.memory_space<vmem>>, vector<256x448xbf16>
    tpu.vector_store %arg3[%c0_3, %c0_4], %3 {strides = array<i32>} : memref<256x448xbf16, #tpu.memory_space<vmem>>, vector<256x448xbf16>,
    return
  }
  func.func @transform_0(%arg0: i32) -> (i32, i32) {
    %c0_i32 = arith.constant 0 : i32
    %c0_i32_0 = arith.constant 0 : i32
    return %arg0, %c0_i32 : i32, i32
  }
  func.func @transform_1(%arg0: i32) -> (i32, i32) {
    %c0_i32 = arith.constant 0 : i32
    %c0_i32_0 = arith.constant 0 : i32
    %c0_i32_1 = arith.constant 0 : i32
    return %c0_i32, %c0_i32_0 : i32, i32
  }
  func.func @transform_2(%arg0: i32) -> (i32, i32) {
    %c0_i32 = arith.constant 0 : i32
    %c0_i32_0 = arith.constant 0 : i32
    return %arg0, %c0_i32 : i32, i32
  }
}

module attributes {stable_mosaic.version = 11 : i64} {
  func.func @_head_kernel(%arg0: i32, %arg1: memref<1x35x64x64xbf16, #tpu.memory_space<vmem>>, %arg2: memref<64x1920xbf16, #tpu.memory_space<vmem>>, %arg3: memref<35x2x1920xbf16, #tpu.memory_space<vmem>>, %arg4: memref<1x1x2xf32, #tpu.memory_space<vmem>>) attributes {dimension_semantics = [#tpu.dimension_semantics<parallel>], iteration_bounds = array<i64: 2>, scalar_prefetch = 0 : i64, scratch_operands = 0 : i64, tpu.core_type = #tpu.core_type<tc>, window_params = [{transform_indices = @transform_0, window_bounds = array<i64: 1, 35, 64, 64>}, {pipeline_mode = #tpu.pipeline_mode<synchronous>, transform_indices = @transform_1, window_bounds = array<i64: 64, 1920>}, {pipeline_mode = #tpu.pipeline_mode<synchronous>, transform_indices = @transform_2, window_bounds = array<i64: 35, 2, 1920>}, {transform_indices = @transform_3, window_bounds = array<i64: 1, 1, 2>}]} {
    %cst = arith.constant 0.000000e+00 : f32
    %0 = vector.broadcast %cst : f32 to vector<1x2xf32>
    %c0_i32 = arith.constant 0 : i32
    %c35_i32 = arith.constant 35 : i32
    %1 = arith.addi %c0_i32, %c35_i32 : i32
    %c1_i32 = arith.constant 1 : i32
    %2 = scf.for %arg5 = %c0_i32 to %1 step %c1_i32 iter_args(%arg6 = %0) -> (vector<1x2xf32>)  : i32 {
      %c0_3 = arith.constant 0 : index
      %5 = arith.index_cast %arg5 : i32 to index
      %c0_4 = arith.constant 0 : index
      %c0_5 = arith.constant 0 : index
      %6 = vector.load %arg1[%c0_3, %5, %c0_4, %c0_5] : memref<1x35x64x64xbf16, #tpu.memory_space<vmem>>, vector<1x1x64x64xbf16>
      %7 = vector.shape_cast %6 : vector<1x1x64x64xbf16> to vector<64x64xbf16>
      %c0_6 = arith.constant 0 : index
      %c0_7 = arith.constant 0 : index
      %8 = vector.load %arg2[%c0_6, %c0_7] : memref<64x1920xbf16, #tpu.memory_space<vmem>>, vector<64x1920xbf16>
      %cst_8 = arith.constant dense<0.000000e+00> : vector<64x1920xf32>
      %9 = tpu.matmul %7, %8, %cst_8 {dimension_numbers = #tpu.dot_dimension_numbers<[1], [0], [0], [1], [0, 0, 1, 1], [], []>} : vector<64x64xbf16>, vector<64x1920xbf16>, vector<64x1920xf32> -> vector<64x1920xf32>
      %cst_9 = arith.constant 0.000000e+00 : f32
      %10 = vector.broadcast %cst_9 : f32 to vector<64x1920xf32>
      %11 = arith.maximumf %9, %10 : vector<64x1920xf32>
      %cst_10 = arith.constant dense<0.000000e+00> : vector<1920xf32>
      %12 = vector.multi_reduction <add>, %11, %cst_10 [0] : vector<64x1920xf32> to vector<1920xf32>
      %13 = vector.shape_cast %12 : vector<1920xf32> to vector<1x1920xf32>
      %cst_11 = arith.constant 0.0204081628 : f32
      %14 = vector.broadcast %cst_11 : f32 to vector<1x1920xf32>
      %15 = arith.mulf %13, %14 : vector<1x1920xf32>
      %16 = arith.index_cast %arg5 : i32 to index
      %c0_12 = arith.constant 0 : index
      %c0_13 = arith.constant 0 : index
      %17 = vector.load %arg3[%16, %c0_12, %c0_13] : memref<35x2x1920xbf16, #tpu.memory_space<vmem>>, vector<1x2x1920xbf16>
      %18 = vector.shape_cast %17 : vector<1x2x1920xbf16> to vector<2x1920xbf16>
      %19 = arith.extf %18 : vector<2x1920xbf16> to vector<2x1920xf32>
      %20 = vector.broadcast %15 : vector<1x1920xf32> to vector<2x1920xf32>
      %21 = arith.mulf %20, %19 : vector<2x1920xf32>
      %cst_14 = arith.constant dense<0.000000e+00> : vector<2xf32>
      %22 = vector.multi_reduction <add>, %21, %cst_14 [1] : vector<2x1920xf32> to vector<2xf32>
      %23 = vector.shape_cast %22 : vector<2xf32> to vector<1x2xf32>
      %24 = arith.addf %arg6, %23 : vector<1x2xf32>
      scf.yield %24 : vector<1x2xf32>
    }
    %c35_i32_0 = arith.constant 35 : i32
    %3 = vector.shape_cast %2 : vector<1x2xf32> to vector<1x1x2xf32>
    %c0 = arith.constant 0 : index
    %c0_1 = arith.constant 0 : index
    %c0_2 = arith.constant 0 : index
    %4 = vector.load %arg4[%c0, %c0_1, %c0_2] : memref<1x1x2xf32, #tpu.memory_space<vmem>>, vector<1x1x2xf32>
    tpu.vector_store %arg4[%c0, %c0_1, %c0_2], %3 {strides = array<i32>} : memref<1x1x2xf32, #tpu.memory_space<vmem>>, vector<1x1x2xf32>,
    return
  }
  func.func @transform_0(%arg0: i32) -> (i32, i32, i32, i32) {
    %c0_i32 = arith.constant 0 : i32
    %c0_i32_0 = arith.constant 0 : i32
    %c0_i32_1 = arith.constant 0 : i32
    %c0_i32_2 = arith.constant 0 : i32
    return %arg0, %c0_i32, %c0_i32_0, %c0_i32_1 : i32, i32, i32, i32
  }
  func.func @transform_1(%arg0: i32) -> (i32, i32) {
    %c0_i32 = arith.constant 0 : i32
    %c0_i32_0 = arith.constant 0 : i32
    %c0_i32_1 = arith.constant 0 : i32
    return %c0_i32, %c0_i32_0 : i32, i32
  }
  func.func @transform_2(%arg0: i32) -> (i32, i32, i32) {
    %c0_i32 = arith.constant 0 : i32
    %c0_i32_0 = arith.constant 0 : i32
    %c0_i32_1 = arith.constant 0 : i32
    %c0_i32_2 = arith.constant 0 : i32
    return %c0_i32, %c0_i32_0, %c0_i32_1 : i32, i32, i32
  }
  func.func @transform_3(%arg0: i32) -> (i32, i32, i32) {
    %c0_i32 = arith.constant 0 : i32
    %c0_i32_0 = arith.constant 0 : i32
    %c0_i32_1 = arith.constant 0 : i32
    return %arg0, %c0_i32, %c0_i32_0 : i32, i32, i32
  }
}

</mosaic_0001>

<bundles_post_ra>
// kernel: spatial_model_forward.2
= control target key start
LH: loop header
LB: loop body
LE: loop exit
PB: predicated region body
PF: predicated region fallthrough
CT: control target
= control target key end

     0   :  { %s3239_s9 = smov 0   ;;  %s4105_s0 = inlined_call_operand.vmem [shape: bf16[512,512], index: 0, kind: input, shape index: {}]   ;;  %s4106_s1 = inlined_call_operand.vmem [shape: bf16[512,448], index: 1, kind: input, shape index: {}]   ;;  %s4107_s2 = inlined_call_operand.vmem [shape: bf16[512,448], index: 2, kind: output, shape index: {}]  }
   0x1 LB: > { %s2585_s10 = sadd.s32 4294967295, %s3222_s9   ;;  %p2589_p0 = scmp.ge.s32.totalorder %s3222_s9, 1  ;;  %s3222_s9 = sphi %s3239_s9, %s12_s9  }
   0x2   : > { %p114_p1 = scmp.lt.s32.totalorder %s3222_s9, 3 }
   0x4   : > { %p115_p2 = pnand %p2589_p0, %p114_p1 }
   0x5   : > { %s2590_s19 = sshll.u32 (!%p115_p2), %s2585_s10, 5 }
   0x6   : > { %118 = sbr.rel (%p115_p2) target bundleno = 529 (0x211), region = 28  ;;  %p139_p3 = scmp.lt.s32.totalorder (!%p115_p2), %s2590_s19, 63 }
   0xb   : > { %v2928_v0 = vld [vmem:[%s4106_s1 + $0xe4] ss:$16 sps:$4 sm:$0xff]   ;;  %v2932_v2 = vld [vmem:[%s4106_s1 + $0xe0] ss:$16 sps:$4 sm:$0xff]   ;;  %s4111_s19 = smov (!%p139_p3, %s2590_s19), 63  ;;  %vm2461_vm0 = vcmask 1043456  }
   0xc   : > { %v2930_v1 = vld [vmem:[%s4106_s1 + $0x2e4] ss:$16 sps:$4 sm:$0xff]   ;;  %1304 = vmatprep.subr.bf16.mxu0 %v2928_v0  ;;  %v2933_v3 = vld [vmem:[%s4106_s1 + $0x2e0] ss:$16 sps:$4 sm:$0xff]   ;;  %s2854_s17 = sshll.u32 %s4111_s19, 4  ;;  %vm2462_vm1 = vcmask 523268  }
   0xd   : > { %1497 = vmatprep.subr.bf16.mxu1 %v2930_v1  ;;  %v2934_v4 = vld [vmem:[%s4106_s1 + $0xc4] ss:$16 sps:$4 sm:$0xff]   ;;  %1305 = vmatpush1.bf16.msra.mxu0 %v2932_v2  ;;  %v2938_v6 = vld [vmem:[%s4106_s1 + $0xc0] ss:$16 sps:$4 sm:$0xff]   ;;  %s3392_s27 = scalar_lea.vmem %s4105_s0, %s2854_s17  ;;  %v3032_v2 = vld [vmem:[%s4106_s1 + $0xec] ss:$16 sps:$4 sm:$0xff]   ;;  %s3942_s26 = scalar_lea.vmem %s4107_s2, %s2854_s17 }
   0xe   : > { %1498 = vmatpush1.bf16.msra.mxu1 %v2933_v3  ;;  %v2936_v5 = vld [vmem:[%s4106_s1 + $0x2c4] ss:$16 sps:$4 sm:$0xff]   ;;  %1306 = vmatprep.subr.bf16.mxu0 %v2934_v4  ;;  %v2939_v7 = vld [vmem:[%s4106_s1 + $0x2c0] ss:$16 sps:$4 sm:$0xff]   ;;  %v3413_v51 = vld [vmem:[%s3392_s27 + $0xc] ss:$16 sps:$4 sm:$0xff]  }
   0xf   : > { %1499 = vmatprep.subr.bf16.mxu1 %v2936_v5  ;;  %v2940_v8 = vld [vmem:[%s4106_s1 + $0xa4] ss:$16 sps:$4 sm:$0xff]   ;;  %v2944_v10 = vld [vmem:[%s4106_s1 + $0xa0] ss:$16 sps:$4 sm:$0xff]   ;;  %1529 = vmatprep.mubr.bf16.mxu1 %v3413_v51  ;;  %v3035_v3 = vld [vmem:[%s4106_s1 + $0x2ec] ss:$16 sps:$4 sm:$0xff]  }
  0x10   : > { %v2942_v9 = vld [vmem:[%s4106_s1 + $0x2a4] ss:$16 sps:$4 sm:$0xff]   ;;  %v2945_v11 = vld [vmem:[%s4106_s1 + $0x2a0] ss:$16 sps:$4 sm:$0xff]   ;;  %v3469_v5 = vld [vmem:[%s3392_s27 + $0x8] ss:$16 sps:$4 sm:$0xff]  }
  0x11   : > { %1307 = vmatpush1.bf16.msra.mxu0 %v2938_v6  ;;  %v2946_v12 = vld [vmem:[%s4106_s1 + $0x84] ss:$16 sps:$4 sm:$0xff]   ;;  %v2950_v14 = vld [vmem:[%s4106_s1 + $0x80] ss:$16 sps:$4 sm:$0xff]   ;;  %v3030_v6 = vld [vmem:[%s4106_s1 + $0xe8] ss:$16 sps:$4 sm:$0xff]  }
  0x12   : > { %1500 = vmatpush1.bf16.msra.mxu1 %v2939_v7  ;;  %1308 = vmatprep.subr.bf16.mxu0 %v2940_v8  ;;  %v2948_v13 = vld [vmem:[%s4106_s1 + $0x284] ss:$16 sps:$4 sm:$0xff]   ;;  %v2951_v15 = vld [vmem:[%s4106_s1 + $0x280] ss:$16 sps:$4 sm:$0xff]   ;;  %v3033_v7 = vld [vmem:[%s4106_s1 + $0x2e8] ss:$16 sps:$4 sm:$0xff]  }
  0x13   : > { %1501 = vmatprep.subr.bf16.mxu1 %v2942_v9  ;;  %v2952_v16 = vld [vmem:[%s4106_s1 + $0x64] ss:$16 sps:$4 sm:$0xff]   ;;  %v2956_v18 = vld [vmem:[%s4106_s1 + $0x60] ss:$16 sps:$4 sm:$0xff]   ;;  %v3481_v9 = vld [vmem:[%s3392_s27 + $0x2c] ss:$16 sps:$4 sm:$0xff]  }
  0x14   : > { %v2954_v17 = vld [vmem:[%s4106_s1 + $0x264] ss:$16 sps:$4 sm:$0xff]   ;;  %v2957_v19 = vld [vmem:[%s4106_s1 + $0x260] ss:$16 sps:$4 sm:$0xff]   ;;  %vm4002_vm2 = vmor %vm2462_vm1, %vm2461_vm0 }
  0x15   : > { %1309 = vmatpush1.bf16.msra.mxu0 %v2944_v10  ;;  %v2958_v20 = vld [vmem:[%s4106_s1 + $0x44] ss:$16 sps:$4 sm:$0xff]   ;;  %v2962_v22 = vld [vmem:[%s4106_s1 + $0x40] ss:$16 sps:$4 sm:$0xff]   ;;  %v3044_v10 = vld [vmem:[%s4106_s1 + $0xcc] ss:$16 sps:$4 sm:$0xff]  }
  0x16   : > { %1502 = vmatpush1.bf16.msra.mxu1 %v2945_v11  ;;  %1310 = vmatprep.subr.bf16.mxu0 %v2946_v12  ;;  %v2960_v21 = vld [vmem:[%s4106_s1 + $0x244] ss:$16 sps:$4 sm:$0xff]   ;;  %v2963_v23 = vld [vmem:[%s4106_s1 + $0x240] ss:$16 sps:$4 sm:$0xff]   ;;  %v3047_v11 = vld [vmem:[%s4106_s1 + $0x2cc] ss:$16 sps:$4 sm:$0xff]  }
  0x17   : > { %1503 = vmatprep.subr.bf16.mxu1 %v2948_v13  ;;  %v2964_v24 = vld [vmem:[%s4106_s1 + $0x24] ss:$16 sps:$4 sm:$0xff]   ;;  %v2968_v26 = vld [vmem:[%s4106_s1 + $0x20] ss:$16 sps:$4 sm:$0xff]   ;;  %v3042_v12 = vld [vmem:[%s4106_s1 + $0xc8] ss:$16 sps:$4 sm:$0xff]  }
  0x18   : > { %v2966_v25 = vld [vmem:[%s4106_s1 + $0x224] ss:$16 sps:$4 sm:$0xff]   ;;  %v2969_v27 = vld [vmem:[%s4106_s1 + $0x220] ss:$16 sps:$4 sm:$0xff]   ;;  %v3045_v13 = vld [vmem:[%s4106_s1 + $0x2c8] ss:$16 sps:$4 sm:$0xff]  }
  0x19   : > { %1311 = vmatpush1.bf16.msra.mxu0 %v2950_v14  ;;  %v2970_v28 = vld [vmem:[%s4106_s1 + $0x4] ss:$16 sps:$4 sm:$0xff]   ;;  %v2974_v30 = vld [vmem:[%s4106_s1] ss:$16 sps:$4 sm:$0xff]   ;;  %v3056_v14 = vld [vmem:[%s4106_s1 + $0xac] ss:$16 sps:$4 sm:$0xff]  }
  0x1a   : > { %1504 = vmatpush1.bf16.msra.mxu1 %v2951_v15  ;;  %1312 = vmatprep.subr.bf16.mxu0 %v2952_v16  ;;  %v2972_v29 = vld [vmem:[%s4106_s1 + $0x204] ss:$16 sps:$4 sm:$0xff]   ;;  %v2975_v31 = vld [vmem:[%s4106_s1 + $0x200] ss:$16 sps:$4 sm:$0xff]   ;;  %v3059_v15 = vld [vmem:[%s4106_s1 + $0x2ac] ss:$16 sps:$4 sm:$0xff]  }
  0x1b   : > { %1505 = vmatprep.subr.bf16.mxu1 %v2954_v17  ;;  %v2976_v32 = vld [vmem:[%s4106_s1 + $0x1e4] ss:$16 sps:$4 sm:$0xff]   ;;  %v2980_v34 = vld [vmem:[%s4106_s1 + $0x1e0] ss:$16 sps:$4 sm:$0xff]   ;;  %v3509_v17 = vld [vmem:[%s3392_s27 + $0x28] ss:$16 sps:$4 sm:$0xff]  }
  0x1c   : > { %v2978_v33 = vld [vmem:[%s4106_s1 + $0x3e4] ss:$16 sps:$4 sm:$0xff]   ;;  %v2981_v35 = vld [vmem:[%s4106_s1 + $0x3e0] ss:$16 sps:$4 sm:$0xff]  }
  0x1d   : > { %1313 = vmatpush1.bf16.msra.mxu0 %v2956_v18  ;;  %v2982_v36 = vld [vmem:[%s4106_s1 + $0x1c4] ss:$16 sps:$4 sm:$0xff]   ;;  %v2986_v38 = vld [vmem:[%s4106_s1 + $0x1c0] ss:$16 sps:$4 sm:$0xff]  }
  0x1e   : > { %1506 = vmatpush1.bf16.msra.mxu1 %v2957_v19  ;;  %1314 = vmatprep.subr.bf16.mxu0 %v2958_v20  ;;  %v2984_v37 = vld [vmem:[%s4106_s1 + $0x3c4] ss:$16 sps:$4 sm:$0xff]   ;;  %v2987_v39 = vld [vmem:[%s4106_s1 + $0x3c0] ss:$16 sps:$4 sm:$0xff]   ;;  %v3515_v19 = vld [vmem:[%s3392_s27 + $0x4c] ss:$16 sps:$4 sm:$0xff]  }
  0x1f   : > { %1507 = vmatprep.subr.bf16.mxu1 %v2960_v21  ;;  %v2988_v40 = vld [vmem:[%s4106_s1 + $0x1a4] ss:$16 sps:$4 sm:$0xff]   ;;  %v2992_v42 = vld [vmem:[%s4106_s1 + $0x1a0] ss:$16 sps:$4 sm:$0xff]   ;;  %v3054_v20 = vld [vmem:[%s4106_s1 + $0xa8] ss:$16 sps:$4 sm:$0xff]  }
  0x20   : > { %v2990_v41 = vld [vmem:[%s4106_s1 + $0x3a4] ss:$16 sps:$4 sm:$0xff]   ;;  %v2993_v43 = vld [vmem:[%s4106_s1 + $0x3a0] ss:$16 sps:$4 sm:$0xff]   ;;  %v3057_v21 = vld [vmem:[%s4106_s1 + $0x2a8] ss:$16 sps:$4 sm:$0xff]  }
  0x21   : > { %1315 = vmatpush1.bf16.msra.mxu0 %v2962_v22  ;;  %v2994_v44 = vld [vmem:[%s4106_s1 + $0x184] ss:$16 sps:$4 sm:$0xff]   ;;  %v2998_v46 = vld [vmem:[%s4106_s1 + $0x180] ss:$16 sps:$4 sm:$0xff]   ;;  %v3068_v22 = vld [vmem:[%s4106_s1 + $0x8c] ss:$16 sps:$4 sm:$0xff]  }
  0x22   : > { %1508 = vmatpush1.bf16.msra.mxu1 %v2963_v23  ;;  %1316 = vmatprep.subr.bf16.mxu0 %v2964_v24  ;;  %v2996_v45 = vld [vmem:[%s4106_s1 + $0x384] ss:$16 sps:$4 sm:$0xff]   ;;  %v2999_v47 = vld [vmem:[%s4106_s1 + $0x380] ss:$16 sps:$4 sm:$0xff]   ;;  %v3071_v23 = vld [vmem:[%s4106_s1 + $0x28c] ss:$16 sps:$4 sm:$0xff]  }
  0x23   : > { %1509 = vmatprep.subr.bf16.mxu1 %v2966_v25  ;;  %v3000_v48 = vld [vmem:[%s4106_s1 + $0x164] ss:$16 sps:$4 sm:$0xff]   ;;  %v3004_v52 = vld [vmem:[%s4106_s1 + $0x160] ss:$16 sps:$4 sm:$0xff]   ;;  %v3066_v24 = vld [vmem:[%s4106_s1 + $0x88] ss:$16 sps:$4 sm:$0xff]  }
  0x24   : > { %v3407_v49 = vld [vmem:[%s3392_s27 + $0x4] ss:$16 sps:$4 sm:$0xff]   ;;  %v3005_v53 = vld [vmem:[%s4106_s1 + $0x360] ss:$16 sps:$4 sm:$0xff]  }
  0x25   : > { %1317 = vmatpush1.bf16.msra.mxu0 %v2968_v26  ;;  %v3002_v50 = vld [vmem:[%s4106_s1 + $0x364] ss:$16 sps:$4 sm:$0xff]   ;;  %1336 = vmatprep.mubr.bf16.mxu0 %v3407_v49  ;;  %v3010_v56 = vld [vmem:[%s4106_s1 + $0x140] ss:$16 sps:$4 sm:$0xff]   ;;  %v3540_v26 = vld [vmem:[%s3392_s27 + $0x48] ss:$16 sps:$4 sm:$0xff]  }
  0x26   : > { %1510 = vmatpush1.bf16.msra.mxu1 %v2969_v27  ;;  %1318 = vmatprep.subr.bf16.mxu0 %v2970_v28  ;;  %v3006_v54 = vld [vmem:[%s4106_s1 + $0x144] ss:$16 sps:$4 sm:$0xff]   ;;  %v3011_v57 = vld [vmem:[%s4106_s1 + $0x340] ss:$16 sps:$4 sm:$0xff]   ;;  %v3069_v27 = vld [vmem:[%s4106_s1 + $0x288] ss:$16 sps:$4 sm:$0xff]  }
  0x27   : > { %1511 = vmatprep.subr.bf16.mxu1 %v2972_v29  ;;  %v3008_v55 = vld [vmem:[%s4106_s1 + $0x344] ss:$16 sps:$4 sm:$0xff]   ;;  %v3016_v60 = vld [vmem:[%s4106_s1 + $0x120] ss:$16 sps:$4 sm:$0xff]   ;;  %v3080_v28 = vld [vmem:[%s4106_s1 + $0x6c] ss:$16 sps:$4 sm:$0xff]  }
  0x28   : > { %v3012_v58 = vld [vmem:[%s4106_s1 + $0x124] ss:$16 sps:$4 sm:$0xff]   ;;  %v3017_v61 = vld [vmem:[%s4106_s1 + $0x320] ss:$16 sps:$4 sm:$0xff]   ;;  %v3083_v29 = vld [vmem:[%s4106_s1 + $0x26c] ss:$16 sps:$4 sm:$0xff]  }
  0x29   : > { %1319 = vmatpush1.bf16.msra.mxu0 %v2974_v30  ;;  %v3014_v59 = vld [vmem:[%s4106_s1 + $0x324] ss:$16 sps:$4 sm:$0xff]   ;;  %v3022_v0 = vld [vmem:[%s4106_s1 + $0x100] ss:$16 sps:$4 sm:$0xff]  }
  0x2a   : > { %1512 = vmatpush1.bf16.msra.mxu1 %v2975_v31  ;;  %1320 = vmatprep.subr.bf16.mxu0 %v2976_v32  ;;  %v3018_v62 = vld [vmem:[%s4106_s1 + $0x104] ss:$16 sps:$4 sm:$0xff]   ;;  %v3023_v1 = vld [vmem:[%s4106_s1 + $0x300] ss:$16 sps:$4 sm:$0xff]   ;;  %v3555_v31 = vld [vmem:[%s3392_s27 + $0x6c] ss:$16 sps:$4 sm:$0xff]  }
  0x2b   : > { %1513 = vmatprep.subr.bf16.mxu1 %v2978_v33  ;;  %v3020_v63 = vld [vmem:[%s4106_s1 + $0x304] ss:$16 sps:$4 sm:$0xff]   ;;  %v3466_v4 = vld [vmem:[%s3392_s27] ss:$16 sps:$4 sm:$0xff]   ;;  %v3078_v32 = vld [vmem:[%s4106_s1 + $0x68] ss:$16 sps:$4 sm:$0xff]  }
  0x2c   : > { %v3478_v8 = vld [vmem:[%s3392_s27 + $0x24] ss:$16 sps:$4 sm:$0xff]   ;;  %v3506_v16 = vld [vmem:[%s3392_s27 + $0x20] ss:$16 sps:$4 sm:$0xff]   ;;  %v3081_v33 = vld [vmem:[%s4106_s1 + $0x268] ss:$16 sps:$4 sm:$0xff]  }
  0x2d   : > { %1321 = vmatpush2.bf16.msra.mxu0 %v2980_v34  ;;  %v3512_v18 = vld [vmem:[%s3392_s27 + $0x44] ss:$16 sps:$4 sm:$0xff]   ;;  %v3537_v25 = vld [vmem:[%s3392_s27 + $0x40] ss:$16 sps:$4 sm:$0xff]   ;;  %v3092_v34 = vld [vmem:[%s4106_s1 + $0x4c] ss:$16 sps:$4 sm:$0xff]  }
  0x2e   : > { %1514 = vmatpush2.bf16.msra.mxu1 %v2981_v35  ;;  %1322 = vmatprep.subr.bf16.mxu0 %v2982_v36  ;;  %v3552_v30 = vld [vmem:[%s3392_s27 + $0x64] ss:$16 sps:$4 sm:$0xff]   ;;  %v3095_v35 = vld [vmem:[%s4106_s1 + $0x24c] ss:$16 sps:$4 sm:$0xff]   ;;  %v3090_v36 = vld [vmem:[%s4106_s1 + $0x48] ss:$16 sps:$4 sm:$0xff]  }
  0x2f   : > { %1515 = vmatprep.subr.bf16.mxu1 %v2984_v37  ;;  %v3093_v37 = vld [vmem:[%s4106_s1 + $0x248] ss:$16 sps:$4 sm:$0xff]  }
  0x31   : > { %1323 = vmatpush2.bf16.msra.mxu0 %v2986_v38  ;;  %v3580_v38 = vld [vmem:[%s3392_s27 + $0x60] ss:$16 sps:$4 sm:$0xff]  }
  0x32   : > { %1516 = vmatpush2.bf16.msra.mxu1 %v2987_v39  ;;  %1324 = vmatprep.subr.bf16.mxu0 %v2988_v40  ;;  %v3104_v39 = vld [vmem:[%s4106_s1 + $0x2c] ss:$16 sps:$4 sm:$0xff]  }
  0x33   : > { %1517 = vmatprep.subr.bf16.mxu1 %v2990_v41  ;;  %v3107_v40 = vld [vmem:[%s4106_s1 + $0x22c] ss:$16 sps:$4 sm:$0xff]   ;;  %v3589_v41 = vld [vmem:[%s3392_s27 + $0x68] ss:$16 sps:$4 sm:$0xff]  }
  0x35   : > { %1325 = vmatpush2.bf16.msra.mxu0 %v2992_v42  ;;  %v3592_v42 = vld [vmem:[%s3392_s27 + $0x84] ss:$16 sps:$4 sm:$0xff]  }
  0x36   : > { %1518 = vmatpush2.bf16.msra.mxu1 %v2993_v43  ;;  %1326 = vmatprep.subr.bf16.mxu0 %v2994_v44  ;;  %v3595_v43 = vld [vmem:[%s3392_s27 + $0x8c] ss:$16 sps:$4 sm:$0xff]   ;;  %v3102_v44 = vld [vmem:[%s4106_s1 + $0x28] ss:$16 sps:$4 sm:$0xff]  }
  0x37   : > { %1519 = vmatprep.subr.bf16.mxu1 %v2996_v45  ;;  %v3105_v45 = vld [vmem:[%s4106_s1 + $0x228] ss:$16 sps:$4 sm:$0xff]  }
  0x39   : > { %1327 = vmatpush2.bf16.msra.mxu0 %v2998_v46  ;;  %v3116_v46 = vld [vmem:[%s4106_s1 + $0xc] ss:$16 sps:$4 sm:$0xff]  }
  0x3a   : > { %1520 = vmatpush2.bf16.msra.mxu1 %v2999_v47  ;;  %1328 = vmatprep.subr.bf16.mxu0 %v3000_v48  ;;  %v3119_v47 = vld [vmem:[%s4106_s1 + $0x20c] ss:$16 sps:$4 sm:$0xff]   ;;  %v3114_v48 = vld [vmem:[%s4106_s1 + $0x8] ss:$16 sps:$4 sm:$0xff]  }
  0x3b   : > { %1521 = vmatprep.subr.bf16.mxu1 %v3002_v50  ;;  %v3617_v50 = vld [vmem:[%s3392_s27 + $0x80] ss:$16 sps:$4 sm:$0xff]  }
  0x3d   : > { %1329 = vmatpush2.bf16.msra.mxu0 %v3004_v52  ;;  %v3620_v52 = vld [vmem:[%s3392_s27 + $0x88] ss:$16 sps:$4 sm:$0xff]  }
  0x3e   : > { %1522 = vmatpush2.bf16.msra.mxu1 %v3005_v53  ;;  %1330 = vmatprep.subr.bf16.mxu0 %v3006_v54  ;;  %v3117_v53 = vld [vmem:[%s4106_s1 + $0x208] ss:$16 sps:$4 sm:$0xff]   ;;  %v3128_v54 = vld [vmem:[%s4106_s1 + $0x1ec] ss:$16 sps:$4 sm:$0xff]  }
  0x3f   : > { %1523 = vmatprep.subr.bf16.mxu1 %v3008_v55  ;;  %v3131_v55 = vld [vmem:[%s4106_s1 + $0x3ec] ss:$16 sps:$4 sm:$0xff]  }
  0x41   : > { %1331 = vmatpush2.bf16.msra.mxu0 %v3010_v56  ;;  %v3632_v56 = vld [vmem:[%s3392_s27 + $0xa4] ss:$16 sps:$4 sm:$0xff]  }
  0x42   : > { %1524 = vmatpush2.bf16.msra.mxu1 %v3011_v57  ;;  %1332 = vmatprep.subr.bf16.mxu0 %v3012_v58  ;;  %v3635_v57 = vld [vmem:[%s3392_s27 + $0xac] ss:$16 sps:$4 sm:$0xff]   ;;  %v3126_v58 = vld [vmem:[%s4106_s1 + $0x1e8] ss:$16 sps:$4 sm:$0xff]  }
  0x43   : > { %1525 = vmatprep.subr.bf16.mxu1 %v3014_v59  ;;  %v3129_v59 = vld [vmem:[%s4106_s1 + $0x3e8] ss:$16 sps:$4 sm:$0xff]  }
  0x45   : > { %1333 = vmatpush2.bf16.msra.mxu0 %v3016_v60  ;;  %v3140_v60 = vld [vmem:[%s4106_s1 + $0x1cc] ss:$16 sps:$4 sm:$0xff]  }
  0x46   : > { %1526 = vmatpush2.bf16.msra.mxu1 %v3017_v61  ;;  %1334 = vmatprep.subr.bf16.mxu0 %v3018_v62  ;;  %v3143_v61 = vld [vmem:[%s4106_s1 + $0x3cc] ss:$16 sps:$4 sm:$0xff]   ;;  %v3138_v62 = vld [vmem:[%s4106_s1 + $0x1c8] ss:$16 sps:$4 sm:$0xff]  }
  0x47   : > { %1527 = vmatprep.subr.bf16.mxu1 %v3020_v63  ;;  %v3141_v63 = vld [vmem:[%s4106_s1 + $0x3c8] ss:$16 sps:$4 sm:$0xff]  }
  0x49   : > { %1335 = vmatpush2.bf16.msra.mxu0 %v3022_v0  ;;  %v3660_v0 = vld [vmem:[%s3392_s27 + $0xa0] ss:$16 sps:$4 sm:$0xff]  }
  0x4a   : > { %1528 = vmatpush2.bf16.msra.mxu1 %v3023_v1  ;;  %1690 = vmatprep.subr.bf16.mxu0 %v3032_v2  ;;  %v3152_v1 = vld [vmem:[%s4106_s1 + $0x1ac] ss:$16 sps:$4 sm:$0xff]  }
  0x4b   : > { %1883 = vmatprep.subr.bf16.mxu1 %v3035_v3  ;;  %v3155_v2 = vld [vmem:[%s4106_s1 + $0x3ac] ss:$16 sps:$4 sm:$0xff]   ;;  %v3669_v3 = vld [vmem:[%s3392_s27 + $0xa8] ss:$16 sps:$4 sm:$0xff]  }
  0x4c   : > { %1337 = vmatmul.mubr.bf16.vlgmr.msra.gmra.mxu0 %v3466_v4 }
  0x4d   : > { %1530 = vmatmul.mubr.bf16.vlgmr.msra.gmra.mxu1 %v3469_v5  ;;  %1691 = vmatpush1.bf16.msra.mxu0 %v3030_v6  ;;  %v3672_v6 = vld [vmem:[%s3392_s27 + $0xc4] ss:$16 sps:$4 sm:$0xff]  }
  0x4e   : > { %1884 = vmatpush1.bf16.msra.mxu1 %v3033_v7  ;;  %1346 = vmatprep.mubr.bf16.mxu0 %v3478_v8  ;;  %v3675_v7 = vld [vmem:[%s3392_s27 + $0xcc] ss:$16 sps:$4 sm:$0xff]  }
  0x4f   : > { %1539 = vmatprep.mubr.bf16.mxu1 %v3481_v9  ;;  %1692 = vmatprep.subr.bf16.mxu0 %v3044_v10  ;;  %v3150_v10 = vld [vmem:[%s4106_s1 + $0x1a8] ss:$16 sps:$4 sm:$0xff]  }
  0x50   : > { %1885 = vmatprep.subr.bf16.mxu1 %v3047_v11  ;;  %v3153_v11 = vld [vmem:[%s4106_s1 + $0x3a8] ss:$16 sps:$4 sm:$0xff]  }
  0x51   : > { %1693 = vmatpush1.bf16.msra.mxu0 %v3042_v12  ;;  %v3164_v12 = vld [vmem:[%s4106_s1 + $0x18c] ss:$16 sps:$4 sm:$0xff]  }
  0x52   : > { %1886 = vmatpush1.bf16.msra.mxu1 %v3045_v13  ;;  %1694 = vmatprep.subr.bf16.mxu0 %v3056_v14  ;;  %v3167_v13 = vld [vmem:[%s4106_s1 + $0x38c] ss:$16 sps:$4 sm:$0xff]   ;;  %v3162_v14 = vld [vmem:[%s4106_s1 + $0x188] ss:$16 sps:$4 sm:$0xff]  }
  0x53   : > { %1887 = vmatprep.subr.bf16.mxu1 %v3059_v15  ;;  %v3697_v15 = vld [vmem:[%s3392_s27 + $0xc0] ss:$16 sps:$4 sm:$0xff]  }
  0x54   : > { %1347 = vmatmul.mubr.bf16.gmra.mxu0 %v3506_v16 }
  0x55   : > { %1540 = vmatmul.mubr.bf16.gmra.mxu1 %v3509_v17  ;;  %1356 = vmatprep.mubr.bf16.mxu0 %v3512_v18 }
  0x56   : > { %1549 = vmatprep.mubr.bf16.mxu1 %v3515_v19  ;;  %1695 = vmatpush1.bf16.msra.mxu0 %v3054_v20  ;;  %v3700_v20 = vld [vmem:[%s3392_s27 + $0xc8] ss:$16 sps:$4 sm:$0xff]  }
  0x57   : > { %1888 = vmatpush1.bf16.msra.mxu1 %v3057_v21  ;;  %1696 = vmatprep.subr.bf16.mxu0 %v3068_v22  ;;  %v3165_v21 = vld [vmem:[%s4106_s1 + $0x388] ss:$16 sps:$4 sm:$0xff]   ;;  %v3706_v22 = vld [vmem:[%s3392_s27 + $0xe4] ss:$16 sps:$4 sm:$0xff]  }
  0x58   : > { %1889 = vmatprep.subr.bf16.mxu1 %v3071_v23  ;;  %v3176_v23 = vld [vmem:[%s4106_s1 + $0x16c] ss:$16 sps:$4 sm:$0xff]  }
  0x5a   : > { %1697 = vmatpush1.bf16.msra.mxu0 %v3066_v24  ;;  %v3712_v24 = vld [vmem:[%s3392_s27 + $0xec] ss:$16 sps:$4 sm:$0xff]  }
  0x5b   : > { %1890 = vmatpush1.bf16.msra.mxu1 %v3069_v27  ;;  %1698 = vmatprep.subr.bf16.mxu0 %v3080_v28  ;;  %v3179_v27 = vld [vmem:[%s4106_s1 + $0x36c] ss:$16 sps:$4 sm:$0xff]   ;;  %v3174_v28 = vld [vmem:[%s4106_s1 + $0x168] ss:$16 sps:$4 sm:$0xff]  }
  0x5c   : > { %1891 = vmatprep.subr.bf16.mxu1 %v3083_v29  ;;  %1357 = vmatmul.mubr.bf16.gmra.mxu0 %v3537_v25  ;;  %v3177_v29 = vld [vmem:[%s4106_s1 + $0x368] ss:$16 sps:$4 sm:$0xff]  }
  0x5d   : > { %1550 = vmatmul.mubr.bf16.gmra.mxu1 %v3540_v26  ;;  %1366 = vmatprep.mubr.bf16.mxu0 %v3552_v30 }
  0x5e   : > { %1559 = vmatprep.mubr.bf16.mxu1 %v3555_v31  ;;  %1699 = vmatpush1.bf16.msra.mxu0 %v3078_v32  ;;  %v3186_v32 = vld [vmem:[%s4106_s1 + $0x148] ss:$16 sps:$4 sm:$0xff]  }
  0x5f   : > { %1892 = vmatpush1.bf16.msra.mxu1 %v3081_v33  ;;  %1700 = vmatprep.subr.bf16.mxu0 %v3092_v34  ;;  %v3188_v33 = vld [vmem:[%s4106_s1 + $0x14c] ss:$16 sps:$4 sm:$0xff]   ;;  %v3189_v34 = vld [vmem:[%s4106_s1 + $0x348] ss:$16 sps:$4 sm:$0xff]  }
  0x60   : > { %1893 = vmatprep.subr.bf16.mxu1 %v3095_v35  ;;  %v3191_v35 = vld [vmem:[%s4106_s1 + $0x34c] ss:$16 sps:$4 sm:$0xff]  }
  0x62   : > { %1701 = vmatpush1.bf16.msra.mxu0 %v3090_v36  ;;  %v3740_v36 = vld [vmem:[%s3392_s27 + $0xe0] ss:$16 sps:$4 sm:$0xff]  }
  0x63   : > { %1894 = vmatpush1.bf16.msra.mxu1 %v3093_v37  ;;  %1702 = vmatprep.subr.bf16.mxu0 %v3104_v39  ;;  %v3743_v37 = vld [vmem:[%s3392_s27 + $0xe8] ss:$16 sps:$4 sm:$0xff]   ;;  %v3746_v39 = vld [vmem:[%s3392_s27 + $0x104] ss:$16 sps:$4 sm:$0xff]  }
  0x64   : > { %1895 = vmatprep.subr.bf16.mxu1 %v3107_v40  ;;  %1367 = vmatmul.mubr.bf16.gmra.mxu0 %v3580_v38  ;;  %v3749_v40 = vld [vmem:[%s3392_s27 + $0x10c] ss:$16 sps:$4 sm:$0xff]  }
  0x65   : > { %1560 = vmatmul.mubr.bf16.gmra.mxu1 %v3589_v41  ;;  %1376 = vmatprep.mubr.bf16.mxu0 %v3592_v42 }
  0x66   : > { %1569 = vmatprep.mubr.bf16.mxu1 %v3595_v43  ;;  %1703 = vmatpush1.bf16.msra.mxu0 %v3102_v44  ;;  %v3198_v44 = vld [vmem:[%s4106_s1 + $0x128] ss:$16 sps:$4 sm:$0xff]  }
  0x67   : > { %1896 = vmatpush1.bf16.msra.mxu1 %v3105_v45  ;;  %1704 = vmatprep.subr.bf16.mxu0 %v3116_v46  ;;  %v3200_v45 = vld [vmem:[%s4106_s1 + $0x12c] ss:$16 sps:$4 sm:$0xff]   ;;  %v3201_v46 = vld [vmem:[%s4106_s1 + $0x328] ss:$16 sps:$4 sm:$0xff]  }
  0x68   : > { %1897 = vmatprep.subr.bf16.mxu1 %v3119_v47  ;;  %v3203_v47 = vld [vmem:[%s4106_s1 + $0x32c] ss:$16 sps:$4 sm:$0xff]  }
  0x6a   : > { %1705 = vmatpush1.bf16.msra.mxu0 %v3114_v48  ;;  %v3768_v48 = vld [vmem:[%s3392_s27 + $0x100] ss:$16 sps:$4 sm:$0xff]  }
  0x6b   : > { %1898 = vmatpush1.bf16.msra.mxu1 %v3117_v53  ;;  %1706 = vmatprep.subr.bf16.mxu0 %v3128_v54  ;;  %v3771_v53 = vld [vmem:[%s3392_s27 + $0x108] ss:$16 sps:$4 sm:$0xff]  }
  0x6c   : > { %1899 = vmatprep.subr.bf16.mxu1 %v3131_v55  ;;  %1377 = vmatmul.mubr.bf16.gmra.mxu0 %v3617_v50  ;;  %v3210_v54 = vld [vmem:[%s4106_s1 + $0x108] ss:$16 sps:$4 sm:$0xff]   ;;  %v3212_v55 = vld [vmem:[%s4106_s1 + $0x10c] ss:$16 sps:$4 sm:$0xff]  }
  0x6d   : > { %1570 = vmatmul.mubr.bf16.gmra.mxu1 %v3620_v52  ;;  %1386 = vmatprep.mubr.bf16.mxu0 %v3632_v56 }
  0x6e   : > { %1579 = vmatprep.mubr.bf16.mxu1 %v3635_v57  ;;  %1707 = vmatpush2.bf16.msra.mxu0 %v3126_v58  ;;  %v3213_v58 = vld [vmem:[%s4106_s1 + $0x308] ss:$16 sps:$4 sm:$0xff]  }
  0x6f   : > { %1900 = vmatpush2.bf16.msra.mxu1 %v3129_v59  ;;  %1708 = vmatprep.subr.bf16.mxu0 %v3140_v60  ;;  %v3215_v59 = vld [vmem:[%s4106_s1 + $0x30c] ss:$16 sps:$4 sm:$0xff]   ;;  %v3786_v60 = vld [vmem:[%s3392_s27 + $0x124] ss:$16 sps:$4 sm:$0xff]  }
  0x70   : > { %1901 = vmatprep.subr.bf16.mxu1 %v3143_v61  ;;  %v3789_v61 = vld [vmem:[%s3392_s27 + $0x12c] ss:$16 sps:$4 sm:$0xff]  }
  0x72   : > { %1709 = vmatpush2.bf16.msra.mxu0 %v3138_v62  ;;  %v3796_v62 = vld [vmem:[%s3392_s27 + $0x120] ss:$16 sps:$4 sm:$0xff]  }
  0x73   : > { %1902 = vmatpush2.bf16.msra.mxu1 %v3141_v63  ;;  %1710 = vmatprep.subr.bf16.mxu0 %v3152_v1  ;;  %v3799_v63 = vld [vmem:[%s3392_s27 + $0x128] ss:$16 sps:$4 sm:$0xff]   ;;  %v3802_v1 = vld [vmem:[%s3392_s27 + $0x144] ss:$16 sps:$4 sm:$0xff]  }
  0x74   : > { %1903 = vmatprep.subr.bf16.mxu1 %v3155_v2  ;;  %1387 = vmatmul.mubr.bf16.gmra.mxu0 %v3660_v0  ;;  %v3805_v2 = vld [vmem:[%s3392_s27 + $0x14c] ss:$16 sps:$4 sm:$0xff]  }
  0x75   : > { %1580 = vmatmul.mubr.bf16.gmra.mxu1 %v3669_v3  ;;  %1396 = vmatprep.mubr.bf16.mxu0 %v3672_v6 }
  0x76   : > { %1589 = vmatprep.mubr.bf16.mxu1 %v3675_v7  ;;  %1711 = vmatpush2.bf16.msra.mxu0 %v3150_v10  ;;  %v3812_v10 = vld [vmem:[%s3392_s27 + $0x140] ss:$16 sps:$4 sm:$0xff]  }
  0x77   : > { %1904 = vmatpush2.bf16.msra.mxu1 %v3153_v11  ;;  %1712 = vmatprep.subr.bf16.mxu0 %v3164_v12  ;;  %v3815_v11 = vld [vmem:[%s3392_s27 + $0x148] ss:$16 sps:$4 sm:$0xff]   ;;  %v3818_v12 = vld [vmem:[%s3392_s27 + $0x164] ss:$16 sps:$4 sm:$0xff]  }
  0x78   : > { %1905 = vmatprep.subr.bf16.mxu1 %v3167_v13  ;;  %v3821_v13 = vld [vmem:[%s3392_s27 + $0x16c] ss:$16 sps:$4 sm:$0xff]  }
  0x7a   : > { %1713 = vmatpush2.bf16.msra.mxu0 %v3162_v14  ;;  %v3828_v14 = vld [vmem:[%s3392_s27 + $0x160] ss:$16 sps:$4 sm:$0xff]  }
  0x7b   : > { %1906 = vmatpush2.bf16.msra.mxu1 %v3165_v21  ;;  %1714 = vmatprep.subr.bf16.mxu0 %v3176_v23  ;;  %v3831_v21 = vld [vmem:[%s3392_s27 + $0x168] ss:$16 sps:$4 sm:$0xff]   ;;  %v3834_v23 = vld [vmem:[%s3392_s27 + $0x184] ss:$16 sps:$4 sm:$0xff]  }
  0x7c   : > { %1907 = vmatprep.subr.bf16.mxu1 %v3179_v27  ;;  %1397 = vmatmul.mubr.bf16.gmra.mxu0 %v3697_v15  ;;  %v3837_v27 = vld [vmem:[%s3392_s27 + $0x18c] ss:$16 sps:$4 sm:$0xff]  }
  0x7d   : > { %1590 = vmatmul.mubr.bf16.gmra.mxu1 %v3700_v20  ;;  %1406 = vmatprep.mubr.bf16.mxu0 %v3706_v22 }
  0x7e   : > { %1599 = vmatprep.mubr.bf16.mxu1 %v3712_v24  ;;  %1715 = vmatpush2.bf16.msra.mxu0 %v3174_v28  ;;  %v3844_v28 = vld [vmem:[%s3392_s27 + $0x180] ss:$16 sps:$4 sm:$0xff]  }
  0x7f   : > { %1908 = vmatpush2.bf16.msra.mxu1 %v3177_v29  ;;  %1716 = vmatprep.subr.bf16.mxu0 %v3188_v33  ;;  %v3847_v29 = vld [vmem:[%s3392_s27 + $0x188] ss:$16 sps:$4 sm:$0xff]   ;;  %v3853_v33 = vld [vmem:[%s3392_s27 + $0x1ac] ss:$16 sps:$4 sm:$0xff]  }
  0x80   : > { %1909 = vmatprep.subr.bf16.mxu1 %v3191_v35  ;;  %v3863_v35 = vld [vmem:[%s3392_s27 + $0x1a8] ss:$16 sps:$4 sm:$0xff]  }
  0x82   : > { %1717 = vmatpush2.bf16.msra.mxu0 %v3186_v32  ;;  %v3850_v32 = vld [vmem:[%s3392_s27 + $0x1a4] ss:$16 sps:$4 sm:$0xff]  }
  0x83   : > { %1910 = vmatpush2.bf16.msra.mxu1 %v3189_v34  ;;  %1718 = vmatprep.subr.bf16.mxu0 %v3200_v45  ;;  %v3860_v34 = vld [vmem:[%s3392_s27 + $0x1a0] ss:$16 sps:$4 sm:$0xff]   ;;  %v3869_v45 = vld [vmem:[%s3392_s27 + $0x1cc] ss:$16 sps:$4 sm:$0xff]  }
  0x84   : > { %1407 = vmatmul.mubr.bf16.gmra.mxu0 %v3740_v36  ;;  %1911 = vmatprep.subr.bf16.mxu1 %v3203_v47  ;;  %v3879_v47 = vld [vmem:[%s3392_s27 + $0x1c8] ss:$16 sps:$4 sm:$0xff]  }
  0x85   : > { %1600 = vmatmul.mubr.bf16.gmra.mxu1 %v3743_v37  ;;  %1416 = vmatprep.mubr.bf16.mxu0 %v3746_v39 }
  0x86   : > { %1609 = vmatprep.mubr.bf16.mxu1 %v3749_v40  ;;  %1719 = vmatpush2.bf16.msra.mxu0 %v3198_v44  ;;  %v3866_v44 = vld [vmem:[%s3392_s27 + $0x1c4] ss:$16 sps:$4 sm:$0xff]  }
  0x87   : > { %1912 = vmatpush2.bf16.msra.mxu1 %v3201_v46  ;;  %1720 = vmatprep.subr.bf16.mxu0 %v3212_v55  ;;  %v3876_v46 = vld [vmem:[%s3392_s27 + $0x1c0] ss:$16 sps:$4 sm:$0xff]   ;;  %v3885_v55 = vld [vmem:[%s3392_s27 + $0x1ec] ss:$16 sps:$4 sm:$0xff]  }
  0x88   : > { %1913 = vmatprep.subr.bf16.mxu1 %v3215_v59  ;;  %v3895_v59 = vld [vmem:[%s3392_s27 + $0x1e8] ss:$16 sps:$4 sm:$0xff]  }
  0x8a   : > { %1721 = vmatpush2.bf16.msra.mxu0 %v3210_v54  ;;  %v3882_v54 = vld [vmem:[%s3392_s27 + $0x1e4] ss:$16 sps:$4 sm:$0xff]  }
  0x8b   : > { %1914 = vmatpush2.bf16.msra.mxu1 %v3213_v58  ;;  %v3892_v58 = vld [vmem:[%s3392_s27 + $0x1e0] ss:$16 sps:$4 sm:$0xff]  }
  0x8c   : > { %1417 = vmatmul.mubr.bf16.gmra.mxu0 %v3768_v48 }
  0x8d   : > { %1610 = vmatmul.mubr.bf16.gmra.mxu1 %v3771_v53  ;;  %1426 = vmatprep.mubr.bf16.mxu0 %v3786_v60 }
  0x8e   : > { %1619 = vmatprep.mubr.bf16.mxu1 %v3789_v61 }
  0x94   : > { %1427 = vmatmul.mubr.bf16.gmra.mxu0 %v3796_v62 }
  0x95   : > { %1620 = vmatmul.mubr.bf16.gmra.mxu1 %v3799_v63  ;;  %1436 = vmatprep.mubr.bf16.mxu0 %v3802_v1 }
  0x96   : > { %1629 = vmatprep.mubr.bf16.mxu1 %v3805_v2 }
  0x9c   : > { %1437 = vmatmul.mubr.bf16.gmra.mxu0 %v3812_v10 }
  0x9d   : > { %1630 = vmatmul.mubr.bf16.gmra.mxu1 %v3815_v11  ;;  %1446 = vmatprep.mubr.bf16.mxu0 %v3818_v12 }
  0x9e   : > { %1639 = vmatprep.mubr.bf16.mxu1 %v3821_v13 }
  0xa4   : > { %1447 = vmatmul.mubr.bf16.gmra.mxu0 %v3828_v14 }
  0xa5   : > { %1640 = vmatmul.mubr.bf16.gmra.mxu1 %v3831_v21  ;;  %1456 = vmatprep.mubr.bf16.mxu0 %v3834_v23 }
  0xa6   : > { %1649 = vmatprep.mubr.bf16.mxu1 %v3837_v27 }
  0xac   : > { %1457 = vmatmul.mubr.bf16.gmra.mxu0 %v3844_v28 }
  0xad   : > { %1650 = vmatmul.mubr.bf16.gmra.mxu1 %v3847_v29  ;;  %1466 = vmatprep.mubr.bf16.mxu0 %v3850_v32 }
  0xae   : > { %1659 = vmatprep.mubr.bf16.mxu1 %v3853_v33 }
  0xb4   : > { %1467 = vmatmul.mubr.bf16.gmra.mxu0 %v3860_v34 }
  0xb5   : > { %1660 = vmatmul.mubr.bf16.gmra.mxu1 %v3863_v35  ;;  %1476 = vmatprep.mubr.bf16.mxu0 %v3866_v44 }
  0xb6   : > { %1669 = vmatprep.mubr.bf16.mxu1 %v3869_v45 }
  0xbc   : > { %1477 = vmatmul.mubr.bf16.gmra.mxu0 %v3876_v46 }
  0xbd   : > { %1670 = vmatmul.mubr.bf16.gmra.mxu1 %v3879_v47  ;;  %1486 = vmatprep.mubr.bf16.mxu0 %v3882_v54 }
  0xbe   : > { %1679 = vmatprep.mubr.bf16.mxu1 %v3885_v55 }
  0xc4   : > { %1487 = vmatmul.mubr.bf16.gmra.mxu0 %v3892_v58 }
  0xc5   : > { %1680 = vmatmul.mubr.bf16.gmra.mxu1 %v3895_v59  ;;  %1722 = vmatprep.mubr.bf16.mxu0 %v3407_v49 }
  0xc6   : > { %1915 = vmatprep.mubr.bf16.mxu1 %v3413_v51 }
  0xcc   : > { %1723 = vmatmul.mubr.bf16.vlgmr.msra.gmra.mxu0 %v3466_v4 }
  0xcd   : > { %1916 = vmatmul.mubr.bf16.vlgmr.msra.gmra.mxu1 %v3469_v5  ;;  %1732 = vmatprep.mubr.bf16.mxu0 %v3478_v8 }
  0xce   : > { %1925 = vmatprep.mubr.bf16.mxu1 %v3481_v9 }
  0xd4   : > { %1733 = vmatmul.mubr.bf16.gmra.mxu0 %v3506_v16 }
  0xd5   : > { %1926 = vmatmul.mubr.bf16.gmra.mxu1 %v3509_v17  ;;  %1742 = vmatprep.mubr.bf16.mxu0 %v3512_v18 }
  0xd6   : > { %1935 = vmatprep.mubr.bf16.mxu1 %v3515_v19 }
  0xdc   : > { %1743 = vmatmul.mubr.bf16.gmra.mxu0 %v3537_v25 }
  0xdd   : > { %1936 = vmatmul.mubr.bf16.gmra.mxu1 %v3540_v26  ;;  %1752 = vmatprep.mubr.bf16.mxu0 %v3552_v30 }
  0xde   : > { %1945 = vmatprep.mubr.bf16.mxu1 %v3555_v31 }
  0xe4   : > { %1753 = vmatmul.mubr.bf16.gmra.mxu0 %v3580_v38 }
  0xe5   : > { %1946 = vmatmul.mubr.bf16.gmra.mxu1 %v3589_v41  ;;  %1762 = vmatprep.mubr.bf16.mxu0 %v3592_v42 }
  0xe6   : > { %1955 = vmatprep.mubr.bf16.mxu1 %v3595_v43 }
  0xec   : > { %1763 = vmatmul.mubr.bf16.gmra.mxu0 %v3617_v50 }
  0xed   : > { %1956 = vmatmul.mubr.bf16.gmra.mxu1 %v3620_v52  ;;  %1772 = vmatprep.mubr.bf16.mxu0 %v3632_v56 }
  0xee   : > { %1965 = vmatprep.mubr.bf16.mxu1 %v3635_v57 }
  0xf4   : > { %1773 = vmatmul.mubr.bf16.gmra.mxu0 %v3660_v0 }
  0xf5   : > { %1966 = vmatmul.mubr.bf16.gmra.mxu1 %v3669_v3  ;;  %1782 = vmatprep.mubr.bf16.mxu0 %v3672_v6 }
  0xf6   : > { %1975 = vmatprep.mubr.bf16.mxu1 %v3675_v7 }
  0xfc   : > { %1783 = vmatmul.mubr.bf16.gmra.mxu0 %v3697_v15 }
  0xfd   : > { %1976 = vmatmul.mubr.bf16.gmra.mxu1 %v3700_v20  ;;  %1792 = vmatprep.mubr.bf16.mxu0 %v3706_v22 }
  0xfe   : > { %1985 = vmatprep.mubr.bf16.mxu1 %v3712_v24 }
 0x104   : > { %1793 = vmatmul.mubr.bf16.gmra.mxu0 %v3740_v36 }
 0x105   : > { %1986 = vmatmul.mubr.bf16.gmra.mxu1 %v3743_v37  ;;  %1802 = vmatprep.mubr.bf16.mxu0 %v3746_v39 }
 0x106   : > { %1995 = vmatprep.mubr.bf16.mxu1 %v3749_v40 }
 0x10c   : > { %v1338_v49 = vpop.f32.mrf.mxu0  ;;  %1803 = vmatmul.mubr.bf16.gmra.mxu0 %v3768_v48 }
 0x10d   : > { %v1531_v51 = vpop.f32.mrf.mxu1  ;;  %1996 = vmatmul.mubr.bf16.gmra.mxu1 %v3771_v53  ;;  %1812 = vmatprep.mubr.bf16.mxu0 %v3786_v60 }
 0x10e   : > { %2005 = vmatprep.mubr.bf16.mxu1 %v3789_v61  ;;  %v1340_v4 = vpop.f32.mrf.mxu0  ;;  %v1532_v8 = vadd.f32 %v1531_v51, %v1338_v49 }
 0x10f   : > { %v1533_v5 = vpop.f32.mrf.mxu1 }
 0x110   : > { %v1534_v9 = vadd.f32 %v1533_v5, %v1340_v4  ;;  %v1342_v16 = vpop.f32.mrf.mxu0 }
 0x111   : > { %v1535_v17 = vpop.f32.mrf.mxu1 }
 0x112   : > { %v2856_v18 = vpack.c.bf16 %v1534_v9, %v1532_v8  ;;  %v1344_v19 = vpop.f32.mrf.mxu0  ;;  %v1536_v26 = vadd.f32 %v1535_v17, %v1342_v16 }
 0x113   : > { %v1537_v25 = vpop.f32.mrf.mxu1 }
 0x114   : > { %2460 = vst [vmem:[%s3942_s26] sm:$0xff] %v2856_v18  ;;  %v1538_v30 = vadd.f32 %v1537_v25, %v1344_v19  ;;  %v1348_v31 = vpop.f32.mrf.mxu0  ;;  %1813 = vmatmul.mubr.bf16.gmra.mxu0 %v3796_v62 }
 0x115   : > { %v1541_v38 = vpop.f32.mrf.mxu1  ;;  %2006 = vmatmul.mubr.bf16.gmra.mxu1 %v3799_v63  ;;  %1822 = vmatprep.mubr.bf16.mxu0 %v3802_v1 }
 0x116   : > { %v2858_v41 = vpack.c.bf16 %v1538_v30, %v1536_v26  ;;  %2015 = vmatprep.mubr.bf16.mxu1 %v3805_v2  ;;  %v1350_v42 = vpop.f32.mrf.mxu0  ;;  %v1542_v50 = vadd.f32 %v1541_v38, %v1348_v31 }
 0x117   : > { %v1543_v43 = vpop.f32.mrf.mxu1 }
 0x118   : > { %2465 = vst [vmem:[%s3942_s26 + $0x10] sm:$0xff] %v2858_v41  ;;  %v1544_v52 = vadd.f32 %v1543_v43, %v1350_v42  ;;  %v1352_v56 = vpop.f32.mrf.mxu0 }
 0x119   : > { %v1545_v57 = vpop.f32.mrf.mxu1 }
 0x11a   : > { %v2860_v0 = vpack.c.bf16 %v1544_v52, %v1542_v50  ;;  %v1354_v3 = vpop.f32.mrf.mxu0  ;;  %v1546_v7 = vadd.f32 %v1545_v57, %v1352_v56 }
 0x11b   : > { %v1547_v6 = vpop.f32.mrf.mxu1 }
 0x11c   : > { %2467 = vst [vmem:[%s3942_s26 + $0x20] sm:$0xff] %v2860_v0  ;;  %v1548_v15 = vadd.f32 %v1547_v6, %v1354_v3  ;;  %v1358_v20 = vpop.f32.mrf.mxu0  ;;  %1823 = vmatmul.mubr.bf16.gmra.mxu0 %v3812_v10 }
 0x11d   : > { %v1551_v22 = vpop.f32.mrf.mxu1  ;;  %2016 = vmatmul.mubr.bf16.gmra.mxu1 %v3815_v11  ;;  %1832 = vmatprep.mubr.bf16.mxu0 %v3818_v12 }
 0x11e   : > { %v2862_v24 = vpack.c.bf16 %v1548_v15, %v1546_v7  ;;  %2025 = vmatprep.mubr.bf16.mxu1 %v3821_v13  ;;  %v1360_v36 = vpop.f32.mrf.mxu0  ;;  %v1552_v39 = vadd.f32 %v1551_v22, %v1358_v20 }
 0x11f   : > { %v1553_v37 = vpop.f32.mrf.mxu1 }
 0x120   : > { %2469 = vst [vmem:[%s3942_s26 + $0x30] sm:$0xff] %v2862_v24  ;;  %v1554_v40 = vadd.f32 %v1553_v37, %v1360_v36  ;;  %v1362_v48 = vpop.f32.mrf.mxu0 }
 0x121   : > { %v1555_v53 = vpop.f32.mrf.mxu1 }
 0x122   : > { %v2864_v60 = vpack.c.bf16 %v1554_v40, %v1552_v39  ;;  %v1364_v61 = vpop.f32.mrf.mxu0  ;;  %v1556_v63 = vadd.f32 %v1555_v53, %v1362_v48 }
 0x123   : > { %v1557_v62 = vpop.f32.mrf.mxu1 }
 0x124   : > { %2471 = vst [vmem:[%s3942_s26 + $0x40] sm:$0xff] %v2864_v60  ;;  %v1558_v1 = vadd.f32 %v1557_v62, %v1364_v61  ;;  %v1368_v2 = vpop.f32.mrf.mxu0  ;;  %1833 = vmatmul.mubr.bf16.gmra.mxu0 %v3828_v14 }
 0x125   : > { %v1561_v10 = vpop.f32.mrf.mxu1  ;;  %2026 = vmatmul.mubr.bf16.gmra.mxu1 %v3831_v21  ;;  %1842 = vmatprep.mubr.bf16.mxu0 %v3834_v23 }
 0x126   : > { %v2866_v11 = vpack.c.bf16 %v1558_v1, %v1556_v63  ;;  %2035 = vmatprep.mubr.bf16.mxu1 %v3837_v27  ;;  %v1370_v12 = vpop.f32.mrf.mxu0  ;;  %v1562_v49 = vadd.f32 %v1561_v10, %v1368_v2 }
 0x127   : > { %v1563_v13 = vpop.f32.mrf.mxu1 }
 0x128   : > { %2473 = vst [vmem:[%s3942_s26 + $0x50] sm:$0xff] %v2866_v11  ;;  %v1564_v51 = vadd.f32 %v1563_v13, %v1370_v12  ;;  %v1372_v4 = vpop.f32.mrf.mxu0 }
 0x129   : > { %v1565_v5 = vpop.f32.mrf.mxu1 }
 0x12a   : > { %v2868_v8 = vpack.c.bf16 %v1564_v51, %v1562_v49  ;;  %v1374_v9 = vpop.f32.mrf.mxu0  ;;  %v1566_v14 = vadd.f32 %v1565_v5, %v1372_v4 }
 0x12b   : > { %v1567_v16 = vpop.f32.mrf.mxu1 }
 0x12c   : > { %2475 = vst [vmem:[%s3942_s26 + $0x60] sm:$0xff] %v2868_v8  ;;  %v1568_v17 = vadd.f32 %v1567_v16, %v1374_v9  ;;  %v1378_v21 = vpop.f32.mrf.mxu0  ;;  %1843 = vmatmul.mubr.bf16.gmra.mxu0 %v3844_v28 }
 0x12d   : > { %v1571_v18 = vpop.f32.mrf.mxu1  ;;  %2036 = vmatmul.mubr.bf16.gmra.mxu1 %v3847_v29  ;;  %1852 = vmatprep.mubr.bf16.mxu0 %v3850_v32 }
 0x12e   : > { %v2870_v23 = vpack.c.bf16 %v1568_v17, %v1566_v14  ;;  %2045 = vmatprep.mubr.bf16.mxu1 %v3853_v33  ;;  %v1380_v27 = vpop.f32.mrf.mxu0  ;;  %v1572_v25 = vadd.f32 %v1571_v18, %v1378_v21 }
 0x12f   : > { %v1573_v19 = vpop.f32.mrf.mxu1 }
 0x130   : > { %2477 = vst [vmem:[%s3942_s26 + $0x70] sm:$0xff] %v2870_v23  ;;  %v1574_v26 = vadd.f32 %v1573_v19, %v1380_v27  ;;  %v1382_v30 = vpop.f32.mrf.mxu0 }
 0x131   : > { %v1575_v31 = vpop.f32.mrf.mxu1 }
 0x132   : > { %v2872_v38 = vpack.c.bf16 %v1574_v26, %v1572_v25  ;;  %v1384_v41 = vpop.f32.mrf.mxu0  ;;  %v1576_v28 = vadd.f32 %v1575_v31, %v1382_v30 }
 0x133   : > { %v1577_v42 = vpop.f32.mrf.mxu1 }
 0x134   : > { %2479 = vst [vmem:[%s3942_s26 + $0x80] sm:$0xff] %v2872_v38  ;;  %v1578_v43 = vadd.f32 %v1577_v42, %v1384_v41  ;;  %v1388_v29 = vpop.f32.mrf.mxu0  ;;  %1853 = vmatmul.mubr.bf16.gmra.mxu0 %v3860_v34 }
 0x135   : > { %v1581_v50 = vpop.f32.mrf.mxu1  ;;  %2046 = vmatmul.mubr.bf16.gmra.mxu1 %v3863_v35  ;;  %1862 = vmatprep.mubr.bf16.mxu0 %v3866_v44 }
 0x136   : > { %v2874_v32 = vpack.c.bf16 %v1578_v43, %v1576_v28  ;;  %2055 = vmatprep.mubr.bf16.mxu1 %v3869_v45  ;;  %v1390_v33 = vpop.f32.mrf.mxu0  ;;  %v1582_v56 = vadd.f32 %v1581_v50, %v1388_v29 }
 0x137   : > { %v1583_v52 = vpop.f32.mrf.mxu1 }
 0x138   : > { %2481 = vst [vmem:[%s3942_s26 + $0x90] sm:$0xff] %v2874_v32  ;;  %v1584_v57 = vadd.f32 %v1583_v52, %v1390_v33  ;;  %v1392_v0 = vpop.f32.mrf.mxu0 }
 0x139   : > { %v1585_v3 = vpop.f32.mrf.mxu1 }
 0x13a   : > { %v2876_v6 = vpack.c.bf16 %v1584_v57, %v1582_v56  ;;  %v1394_v7 = vpop.f32.mrf.mxu0  ;;  %v1586_v34 = vadd.f32 %v1585_v3, %v1392_v0 }
 0x13b   : > { %v1587_v15 = vpop.f32.mrf.mxu1 }
 0x13c   : > { %2483 = vst [vmem:[%s3942_s26 + $0xa0] sm:$0xff] %v2876_v6  ;;  %v1588_v20 = vadd.f32 %v1587_v15, %v1394_v7  ;;  %v1398_v35 = vpop.f32.mrf.mxu0  ;;  %1863 = vmatmul.mubr.bf16.gmra.mxu0 %v3876_v46 }
 0x13d   : > { %v1591_v22 = vpop.f32.mrf.mxu1  ;;  %2056 = vmatmul.mubr.bf16.gmra.mxu1 %v3879_v47  ;;  %1872 = vmatprep.mubr.bf16.mxu0 %v3882_v54 }
 0x13e   : > { %v2878_v44 = vpack.c.bf16 %v1588_v20, %v1586_v34  ;;  %2065 = vmatprep.mubr.bf16.mxu1 %v3885_v55  ;;  %v1400_v45 = vpop.f32.mrf.mxu0  ;;  %v1592_v36 = vadd.f32 %v1591_v22, %v1398_v35 }
 0x13f   : > { %v1593_v24 = vpop.f32.mrf.mxu1 }
 0x140   : > { %2485 = vst [vmem:[%s3942_s26 + $0xb0] sm:$0xff] %v2878_v44  ;;  %v1594_v37 = vadd.f32 %v1593_v24, %v1400_v45  ;;  %v1402_v39 = vpop.f32.mrf.mxu0 }
 0x141   : > { %v1595_v40 = vpop.f32.mrf.mxu1 }
 0x142   : > { %v2880_v48 = vpack.c.bf16 %v1594_v37, %v1592_v36  ;;  %v1404_v53 = vpop.f32.mrf.mxu0  ;;  %v1596_v46 = vadd.f32 %v1595_v40, %v1402_v39 }
 0x143   : > { %v1597_v60 = vpop.f32.mrf.mxu1 }
 0x144   : > { %2487 = vst [vmem:[%s3942_s26 + $0xc0] sm:$0xff] %v2880_v48  ;;  %v1598_v61 = vadd.f32 %v1597_v60, %v1404_v53  ;;  %v1408_v47 = vpop.f32.mrf.mxu0  ;;  %1873 = vmatmul.mubr.bf16.gmra.mxu0 %v3892_v58 }
 0x145   : > { %v1601_v62 = vpop.f32.mrf.mxu1  ;;  %2066 = vmatmul.mubr.bf16.gmra.mxu1 %v3895_v59 }
 0x146   : > { %v2882_v54 = vpack.c.bf16 %v1598_v61, %v1596_v46  ;;  %v1410_v55 = vpop.f32.mrf.mxu0  ;;  %v1602_v1 = vadd.f32 %v1601_v62, %v1408_v47 }
 0x147   : > { %v1603_v63 = vpop.f32.mrf.mxu1 }
 0x148   : > { %2489 = vst [vmem:[%s3942_s26 + $0xd0] sm:$0xff] %v2882_v54  ;;  %v1604_v2 = vadd.f32 %v1603_v63, %v1410_v55  ;;  %v1412_v10 = vpop.f32.mrf.mxu0 }
 0x149   : > { %v1605_v11 = vpop.f32.mrf.mxu1 }
 0x14a   : > { %v2884_v12 = vpack.c.bf16 %v1604_v2, %v1602_v1  ;;  %v1414_v13 = vpop.f32.mrf.mxu0  ;;  %v1606_v51 = vadd.f32 %v1605_v11, %v1412_v10 }
 0x14b   : > { %v1607_v49 = vpop.f32.mrf.mxu1 }
 0x14c   : > { %2491 = vst [vmem:[%s3942_s26 + $0xe0] sm:$0xff] %v2884_v12  ;;  %v1608_v4 = vadd.f32 %v1607_v49, %v1414_v13  ;;  %v1418_v5 = vpop.f32.mrf.mxu0 }
 0x14d   : > { %v1611_v58 = vpop.f32.mrf.mxu1 }
 0x14e   : > { %v2886_v8 = vpack.c.bf16 %v1608_v4, %v1606_v51  ;;  %v1420_v59 = vpop.f32.mrf.mxu0  ;;  %v1612_v16 = vadd.f32 %v1611_v58, %v1418_v5 }
 0x14f   : > { %v1613_v9 = vpop.f32.mrf.mxu1 }
 0x150   : > { %2493 = vst [vmem:[%s3942_s26 + $0xf0] sm:$0xff] %v2886_v8  ;;  %v1614_v14 = vadd.f32 %v1613_v9, %v1420_v59  ;;  %v1422_v17 = vpop.f32.mrf.mxu0 }
 0x151   : > { %v1615_v21 = vpop.f32.mrf.mxu1 }
 0x152   : > { %v2888_v18 = vpack.c.bf16 %v1614_v14, %v1612_v16  ;;  %v1424_v23 = vpop.f32.mrf.mxu0  ;;  %v1616_v19 = vadd.f32 %v1615_v21, %v1422_v17 }
 0x153   : > { %v1617_v27 = vpop.f32.mrf.mxu1 }
 0x154   : > { %2495 = vst [vmem:[%s3942_s26 + $0x100] sm:$0xff] %v2888_v18  ;;  %v1618_v25 = vadd.f32 %v1617_v27, %v1424_v23  ;;  %v1428_v26 = vpop.f32.mrf.mxu0 }
 0x155   : > { %v1621_v30 = vpop.f32.mrf.mxu1 }
 0x156   : > { %v2890_v31 = vpack.c.bf16 %v1618_v25, %v1616_v19  ;;  %v1430_v38 = vpop.f32.mrf.mxu0  ;;  %v1622_v42 = vadd.f32 %v1621_v30, %v1428_v26 }
 0x157   : > { %v1623_v41 = vpop.f32.mrf.mxu1 }
 0x158   : > { %2497 = vst [vmem:[%s3942_s26 + $0x110] sm:$0xff] %v2890_v31  ;;  %v1624_v28 = vadd.f32 %v1623_v41, %v1430_v38  ;;  %v1432_v43 = vpop.f32.mrf.mxu0 }
 0x159   : > { %v1625_v29 = vpop.f32.mrf.mxu1 }
 0x15a   : > { %v2892_v50 = vpack.c.bf16 %v1624_v28, %v1622_v42  ;;  %v1434_v32 = vpop.f32.mrf.mxu0  ;;  %v1626_v52 = vadd.f32 %v1625_v29, %v1432_v43 }
 0x15b   : > { %v1627_v33 = vpop.f32.mrf.mxu1 }
 0x15c   : > { %2499 = vst [vmem:[%s3942_s26 + $0x120] sm:$0xff] %v2892_v50  ;;  %v1628_v56 = vadd.f32 %v1627_v33, %v1434_v32  ;;  %v1438_v57 = vpop.f32.mrf.mxu0 }
 0x15d   : > { %v1631_v0 = vpop.f32.mrf.mxu1 }
 0x15e   : > { %v2894_v3 = vpack.c.bf16 %v1628_v56, %v1626_v52  ;;  %v1440_v6 = vpop.f32.mrf.mxu0  ;;  %v1632_v15 = vadd.f32 %v1631_v0, %v1438_v57 }
 0x15f   : > { %v1633_v7 = vpop.f32.mrf.mxu1 }
 0x160   : > { %2501 = vst [vmem:[%s3942_s26 + $0x130] sm:$0xff] %v2894_v3  ;;  %v1634_v34 = vadd.f32 %v1633_v7, %v1440_v6  ;;  %v1442_v20 = vpop.f32.mrf.mxu0 }
 0x161   : > { %v1635_v35 = vpop.f32.mrf.mxu1 }
 0x162   : > { %v2896_v22 = vpack.c.bf16 %v1634_v34, %v1632_v15  ;;  %v1444_v44 = vpop.f32.mrf.mxu0  ;;  %v1636_v24 = vadd.f32 %v1635_v35, %v1442_v20 }
 0x163   : > { %v1637_v45 = vpop.f32.mrf.mxu1 }
 0x164   : > { %2503 = vst [vmem:[%s3942_s26 + $0x140] sm:$0xff] %v2896_v22  ;;  %v1638_v36 = vadd.f32 %v1637_v45, %v1444_v44  ;;  %v1448_v37 = vpop.f32.mrf.mxu0 }
 0x165   : > { %v1641_v39 = vpop.f32.mrf.mxu1 }
 0x166   : > { %v2898_v40 = vpack.c.bf16 %v1638_v36, %v1636_v24  ;;  %v1450_v48 = vpop.f32.mrf.mxu0  ;;  %v1642_v60 = vadd.f32 %v1641_v39, %v1448_v37 }
 0x167   : > { %v1643_v53 = vpop.f32.mrf.mxu1 }
 0x168   : > { %2505 = vst [vmem:[%s3942_s26 + $0x150] sm:$0xff] %v2898_v40  ;;  %v1644_v46 = vadd.f32 %v1643_v53, %v1450_v48  ;;  %v1452_v61 = vpop.f32.mrf.mxu0 }
 0x169   : > { %v1645_v47 = vpop.f32.mrf.mxu1 }
 0x16a   : > { %v2900_v62 = vpack.c.bf16 %v1644_v46, %v1642_v60  ;;  %v1454_v54 = vpop.f32.mrf.mxu0  ;;  %v1646_v63 = vadd.f32 %v1645_v47, %v1452_v61 }
 0x16b   : > { %v1647_v55 = vpop.f32.mrf.mxu1 }
 0x16c   : > { %2507 = vst [vmem:[%s3942_s26 + $0x160] sm:$0xff] %v2900_v62  ;;  %v1648_v1 = vadd.f32 %v1647_v55, %v1454_v54  ;;  %v1458_v2 = vpop.f32.mrf.mxu0 }
 0x16d   : > { %v1651_v10 = vpop.f32.mrf.mxu1 }
 0x16e   : > { %v2902_v11 = vpack.c.bf16 %v1648_v1, %v1646_v63  ;;  %v1460_v12 = vpop.f32.mrf.mxu0  ;;  %v1652_v49 = vadd.f32 %v1651_v10, %v1458_v2 }
 0x16f   : > { %v1653_v13 = vpop.f32.mrf.mxu1 }
 0x170   : > { %2509 = vst [vmem:[%s3942_s26 + $0x170] sm:$0xff] %v2902_v11  ;;  %v1654_v51 = vadd.f32 %v1653_v13, %v1460_v12  ;;  %v1462_v4 = vpop.f32.mrf.mxu0 }
 0x171   : > { %v1655_v5 = vpop.f32.mrf.mxu1 }
 0x172   : > { %v2904_v58 = vpack.c.bf16 %v1654_v51, %v1652_v49  ;;  %v1464_v8 = vpop.f32.mrf.mxu0  ;;  %v1656_v9 = vadd.f32 %v1655_v5, %v1462_v4 }
 0x173   : > { %v1657_v59 = vpop.f32.mrf.mxu1 }
 0x174   : > { %2511 = vst [vmem:[%s3942_s26 + $0x180] sm:$0xff] %v2904_v58  ;;  %v1658_v16 = vadd.f32 %v1657_v59, %v1464_v8  ;;  %v1468_v14 = vpop.f32.mrf.mxu0 }
 0x175   : > { %v1661_v17 = vpop.f32.mrf.mxu1 }
 0x176   : > { %v2906_v21 = vpack.c.bf16 %v1658_v16, %v1656_v9  ;;  %v1470_v18 = vpop.f32.mrf.mxu0  ;;  %v1662_v27 = vadd.f32 %v1661_v17, %v1468_v14 }
 0x177   : > { %v1663_v23 = vpop.f32.mrf.mxu1 }
 0x178   : > { %2513 = vst [vmem:[%s3942_s26 + $0x190] sm:$0xff] %v2906_v21  ;;  %v1664_v19 = vadd.f32 %v1663_v23, %v1470_v18  ;;  %v1472_v25 = vpop.f32.mrf.mxu0 }
 0x179   : > { %v1665_v26 = vpop.f32.mrf.mxu1 }
 0x17a   : > { %v2908_v30 = vpack.c.bf16 %v1664_v19, %v1662_v27  ;;  %v1474_v31 = vpop.f32.mrf.mxu0  ;;  %v1666_v41 = vadd.f32 %v1665_v26, %v1472_v25 }
 0x17b   : > { %v1667_v38 = vpop.f32.mrf.mxu1 }
 0x17c   : > { %2515 = vst [vmem:[%s3942_s26 + $0x1a0] sm:$0xff] %v2908_v30  ;;  %v1668_v42 = vadd.f32 %v1667_v38, %v1474_v31  ;;  %v1478_v28 = vpop.f32.mrf.mxu0 }
 0x17d   : > { %v1671_v43 = vpop.f32.mrf.mxu1 }
 0x17e   : > { %v2910_v29 = vpack.c.bf16 %v1668_v42, %v1666_v41  ;;  %v1480_v50 = vpop.f32.mrf.mxu0  ;;  %v1672_v33 = vadd.f32 %v1671_v43, %v1478_v28 }
 0x17f   : > { %v1673_v32 = vpop.f32.mrf.mxu1 }
 0x180   : > { %2517 = vst [vmem:[%s3942_s26 + $0x1b0] sm:$0xff] %v2910_v29  ;;  %v1674_v52 = vadd.f32 %v1673_v32, %v1480_v50  ;;  %v1482_v56 = vpop.f32.mrf.mxu0 }
 0x181   : > { %v1675_v57 = vpop.f32.mrf.mxu1 }
 0x182   : > { %v2912_v0 = vpack.c.bf16 %v1674_v52, %v1672_v33  ;;  %v1484_v3 = vpop.f32.mrf.mxu0  ;;  %v1676_v7 = vadd.f32 %v1675_v57, %v1482_v56 }
 0x183   : > { %v1677_v6 = vpop.f32.mrf.mxu1 }
 0x184   : > { %2519 = vst [vmem:[%s3942_s26 + $0x1c0] sm:$0xff] %v2912_v0  ;;  %v1678_v15 = vadd.f32 %v1677_v6, %v1484_v3  ;;  %v1488_v34 = vpop.f32.mrf.mxu0 }
 0x185   : > { %v1681_v20 = vpop.f32.mrf.mxu1 }
 0x186   : > { %v2914_v35 = vpack.c.bf16 %v1678_v15, %v1676_v7  ;;  %v1490_v22 = vpop.f32.mrf.mxu0  ;;  %v1682_v45 = vadd.f32 %v1681_v20, %v1488_v34 }
 0x187   : > { %v1683_v44 = vpop.f32.mrf.mxu1 }
 0x188   : > { %2521 = vst [vmem:[%s3942_s26 + $0x1d0] sm:$0xff] %v2914_v35  ;;  %v1684_v24 = vadd.f32 %v1683_v44, %v1490_v22  ;;  %v1492_v36 = vpop.f32.mrf.mxu0 }
 0x189   : > { %v1685_v37 = vpop.f32.mrf.mxu1 }
 0x18a   : > { %v2916_v39 = vpack.c.bf16 %v1684_v24, %v1682_v45  ;;  %v1494_v40 = vpop.f32.mrf.mxu0  ;;  %v1686_v53 = vadd.f32 %v1685_v37, %v1492_v36 }
 0x18b   : > { %v1687_v48 = vpop.f32.mrf.mxu1 }
 0x18c   : > { %2523 = vst [vmem:[%s3942_s26 + $0x1e0] sm:$0xff] %v2916_v39  ;;  %v1688_v60 = vadd.f32 %v1687_v48, %v1494_v40  ;;  %v1724_v46 = vpop.f32.mrf.mxu0 }
 0x18d   : > { %v1917_v61 = vpop.f32.mrf.mxu1 }
 0x18e   : > { %v2918_v47 = vpack.c.bf16 %v1688_v60, %v1686_v53  ;;  %v1726_v62 = vpop.f32.mrf.mxu0  ;;  %v1918_v55 = vadd.f32 %v1917_v61, %v1724_v46 }
 0x18f   : > { %v1919_v54 = vpop.f32.mrf.mxu1 }
 0x190   : > { %2525 = vst [vmem:[%s3942_s26 + $0x1f0] sm:$0xff] %v2918_v47  ;;  %v1920_v63 = vadd.f32 %v1919_v54, %v1726_v62  ;;  %v1728_v2 = vpop.f32.mrf.mxu0 }
 0x191   : > { %v1921_v10 = vpop.f32.mrf.mxu1 }
 0x192   : > { %v2857_v11 = vpack.c.bf16 %v1920_v63, %v1918_v55  ;;  %v1730_v12 = vpop.f32.mrf.mxu0  ;;  %v1922_v49 = vadd.f32 %v1921_v10, %v1728_v2 }
 0x193   : > { %v1923_v13 = vpop.f32.mrf.mxu1 }
 0x194   : > { %2464 = vst.msk [vmem:[%s3942_s26 + $0x8] sm:$0xff] %vm4002_vm2, %v2857_v11  ;;  %v1924_v51 = vadd.f32 %v1923_v13, %v1730_v12  ;;  %v1734_v4 = vpop.f32.mrf.mxu0 }
 0x195   : > { %v1927_v5 = vpop.f32.mrf.mxu1 }
 0x196   : > { %v2859_v58 = vpack.c.bf16 %v1924_v51, %v1922_v49  ;;  %v1736_v8 = vpop.f32.mrf.mxu0  ;;  %v1928_v9 = vadd.f32 %v1927_v5, %v1734_v4 }
 0x197   : > { %v1929_v59 = vpop.f32.mrf.mxu1 }
 0x198   : > { %2466 = vst.msk [vmem:[%s3942_s26 + $0x18] sm:$0xff] %vm4002_vm2, %v2859_v58  ;;  %v1930_v16 = vadd.f32 %v1929_v59, %v1736_v8  ;;  %v1738_v14 = vpop.f32.mrf.mxu0 }
 0x199   : > { %v1931_v17 = vpop.f32.mrf.mxu1 }
 0x19a   : > { %v2861_v21 = vpack.c.bf16 %v1930_v16, %v1928_v9  ;;  %v1740_v18 = vpop.f32.mrf.mxu0  ;;  %v1932_v27 = vadd.f32 %v1931_v17, %v1738_v14 }
 0x19b   : > { %v1933_v23 = vpop.f32.mrf.mxu1 }
 0x19c   : > { %2468 = vst.msk [vmem:[%s3942_s26 + $0x28] sm:$0xff] %vm4002_vm2, %v2861_v21  ;;  %v1934_v19 = vadd.f32 %v1933_v23, %v1740_v18  ;;  %v1744_v25 = vpop.f32.mrf.mxu0 }
 0x19d   : > { %v1937_v26 = vpop.f32.mrf.mxu1 }
 0x19e   : > { %v2863_v30 = vpack.c.bf16 %v1934_v19, %v1932_v27  ;;  %v1746_v31 = vpop.f32.mrf.mxu0  ;;  %v1938_v41 = vadd.f32 %v1937_v26, %v1744_v25 }
 0x19f   : > { %v1939_v38 = vpop.f32.mrf.mxu1 }
 0x1a0   : > { %2470 = vst.msk [vmem:[%s3942_s26 + $0x38] sm:$0xff] %vm4002_vm2, %v2863_v30  ;;  %v1940_v42 = vadd.f32 %v1939_v38, %v1746_v31  ;;  %v1748_v28 = vpop.f32.mrf.mxu0 }
 0x1a1   : > { %v1941_v43 = vpop.f32.mrf.mxu1 }
 0x1a2   : > { %v2865_v29 = vpack.c.bf16 %v1940_v42, %v1938_v41  ;;  %v1750_v50 = vpop.f32.mrf.mxu0  ;;  %v1942_v33 = vadd.f32 %v1941_v43, %v1748_v28 }
 0x1a3   : > { %v1943_v32 = vpop.f32.mrf.mxu1 }
 0x1a4   : > { %2472 = vst.msk [vmem:[%s3942_s26 + $0x48] sm:$0xff] %vm4002_vm2, %v2865_v29  ;;  %v1944_v52 = vadd.f32 %v1943_v32, %v1750_v50  ;;  %v1754_v56 = vpop.f32.mrf.mxu0 }
 0x1a5   : > { %v1947_v57 = vpop.f32.mrf.mxu1 }
 0x1a6   : > { %v2867_v0 = vpack.c.bf16 %v1944_v52, %v1942_v33  ;;  %v1756_v3 = vpop.f32.mrf.mxu0  ;;  %v1948_v7 = vadd.f32 %v1947_v57, %v1754_v56 }
 0x1a7   : > { %v1949_v6 = vpop.f32.mrf.mxu1 }
 0x1a8   : > { %2474 = vst.msk [vmem:[%s3942_s26 + $0x58] sm:$0xff] %vm4002_vm2, %v2867_v0  ;;  %v1950_v15 = vadd.f32 %v1949_v6, %v1756_v3  ;;  %v1758_v34 = vpop.f32.mrf.mxu0 }
 0x1a9   : > { %v1951_v20 = vpop.f32.mrf.mxu1 }
 0x1aa   : > { %v2869_v35 = vpack.c.bf16 %v1950_v15, %v1948_v7  ;;  %v1760_v22 = vpop.f32.mrf.mxu0  ;;  %v1952_v45 = vadd.f32 %v1951_v20, %v1758_v34 }
 0x1ab   : > { %v1953_v44 = vpop.f32.mrf.mxu1 }
 0x1ac   : > { %2476 = vst.msk [vmem:[%s3942_s26 + $0x68] sm:$0xff] %vm4002_vm2, %v2869_v35  ;;  %v1954_v24 = vadd.f32 %v1953_v44, %v1760_v22  ;;  %v1764_v36 = vpop.f32.mrf.mxu0 }
 0x1ad   : > { %v1957_v37 = vpop.f32.mrf.mxu1 }
 0x1ae   : > { %v2871_v39 = vpack.c.bf16 %v1954_v24, %v1952_v45  ;;  %v1766_v40 = vpop.f32.mrf.mxu0  ;;  %v1958_v53 = vadd.f32 %v1957_v37, %v1764_v36 }
 0x1af   : > { %v1959_v48 = vpop.f32.mrf.mxu1 }
 0x1b0   : > { %2478 = vst.msk [vmem:[%s3942_s26 + $0x78] sm:$0xff] %vm4002_vm2, %v2871_v39  ;;  %v1960_v60 = vadd.f32 %v1959_v48, %v1766_v40  ;;  %v1768_v46 = vpop.f32.mrf.mxu0 }
 0x1b1   : > { %v1961_v61 = vpop.f32.mrf.mxu1 }
 0x1b2   : > { %v2873_v47 = vpack.c.bf16 %v1960_v60, %v1958_v53  ;;  %v1770_v62 = vpop.f32.mrf.mxu0  ;;  %v1962_v55 = vadd.f32 %v1961_v61, %v1768_v46 }
 0x1b3   : > { %v1963_v54 = vpop.f32.mrf.mxu1 }
 0x1b4   : > { %2480 = vst.msk [vmem:[%s3942_s26 + $0x88] sm:$0xff] %vm4002_vm2, %v2873_v47  ;;  %v1964_v63 = vadd.f32 %v1963_v54, %v1770_v62  ;;  %v1774_v2 = vpop.f32.mrf.mxu0 }
 0x1b5   : > { %v1967_v10 = vpop.f32.mrf.mxu1 }
 0x1b6   : > { %v2875_v11 = vpack.c.bf16 %v1964_v63, %v1962_v55  ;;  %v1776_v12 = vpop.f32.mrf.mxu0  ;;  %v1968_v49 = vadd.f32 %v1967_v10, %v1774_v2 }
 0x1b7   : > { %v1969_v13 = vpop.f32.mrf.mxu1 }
 0x1b8   : > { %2482 = vst.msk [vmem:[%s3942_s26 + $0x98] sm:$0xff] %vm4002_vm2, %v2875_v11  ;;  %v1970_v51 = vadd.f32 %v1969_v13, %v1776_v12  ;;  %v1778_v4 = vpop.f32.mrf.mxu0 }
 0x1b9   : > { %v1971_v5 = vpop.f32.mrf.mxu1 }
 0x1ba   : > { %v2877_v58 = vpack.c.bf16 %v1970_v51, %v1968_v49  ;;  %v1780_v8 = vpop.f32.mrf.mxu0  ;;  %v1972_v9 = vadd.f32 %v1971_v5, %v1778_v4 }
 0x1bb   : > { %v1973_v59 = vpop.f32.mrf.mxu1 }
 0x1bc   : > { %2484 = vst.msk [vmem:[%s3942_s26 + $0xa8] sm:$0xff] %vm4002_vm2, %v2877_v58  ;;  %v1974_v16 = vadd.f32 %v1973_v59, %v1780_v8  ;;  %v1784_v14 = vpop.f32.mrf.mxu0 }
 0x1bd   : > { %v1977_v17 = vpop.f32.mrf.mxu1 }
 0x1be   : > { %v2879_v21 = vpack.c.bf16 %v1974_v16, %v1972_v9  ;;  %v1786_v18 = vpop.f32.mrf.mxu0  ;;  %v1978_v27 = vadd.f32 %v1977_v17, %v1784_v14 }
 0x1bf   : > { %v1979_v23 = vpop.f32.mrf.mxu1 }
 0x1c0   : > { %2486 = vst.msk [vmem:[%s3942_s26 + $0xb8] sm:$0xff] %vm4002_vm2, %v2879_v21  ;;  %v1980_v19 = vadd.f32 %v1979_v23, %v1786_v18  ;;  %v1788_v25 = vpop.f32.mrf.mxu0 }
 0x1c1   : > { %v1981_v26 = vpop.f32.mrf.mxu1 }
 0x1c2   : > { %v2881_v30 = vpack.c.bf16 %v1980_v19, %v1978_v27  ;;  %v1790_v31 = vpop.f32.mrf.mxu0  ;;  %v1982_v41 = vadd.f32 %v1981_v26, %v1788_v25 }
 0x1c3   : > { %v1983_v38 = vpop.f32.mrf.mxu1 }
 0x1c4   : > { %2488 = vst.msk [vmem:[%s3942_s26 + $0xc8] sm:$0xff] %vm4002_vm2, %v2881_v30  ;;  %v1984_v42 = vadd.f32 %v1983_v38, %v1790_v31  ;;  %v1794_v28 = vpop.f32.mrf.mxu0 }
 0x1c5   : > { %v1987_v43 = vpop.f32.mrf.mxu1 }
 0x1c6   : > { %v2883_v29 = vpack.c.bf16 %v1984_v42, %v1982_v41  ;;  %v1796_v50 = vpop.f32.mrf.mxu0  ;;  %v1988_v33 = vadd.f32 %v1987_v43, %v1794_v28 }
 0x1c7   : > { %v1989_v32 = vpop.f32.mrf.mxu1 }
 0x1c8   : > { %2490 = vst.msk [vmem:[%s3942_s26 + $0xd8] sm:$0xff] %vm4002_vm2, %v2883_v29  ;;  %v1990_v52 = vadd.f32 %v1989_v32, %v1796_v50  ;;  %v1798_v56 = vpop.f32.mrf.mxu0 }
 0x1c9   : > { %v1991_v57 = vpop.f32.mrf.mxu1 }
 0x1ca   : > { %v2885_v0 = vpack.c.bf16 %v1990_v52, %v1988_v33  ;;  %v1800_v3 = vpop.f32.mrf.mxu0  ;;  %v1992_v7 = vadd.f32 %v1991_v57, %v1798_v56 }
 0x1cb   : > { %v1993_v6 = vpop.f32.mrf.mxu1 }
 0x1cc   : > { %2492 = vst.msk [vmem:[%s3942_s26 + $0xe8] sm:$0xff] %vm4002_vm2, %v2885_v0  ;;  %v1994_v15 = vadd.f32 %v1993_v6, %v1800_v3  ;;  %v1804_v34 = vpop.f32.mrf.mxu0 }
 0x1cd   : > { %v1997_v20 = vpop.f32.mrf.mxu1 }
 0x1ce   : > { %v2887_v35 = vpack.c.bf16 %v1994_v15, %v1992_v7  ;;  %v1806_v22 = vpop.f32.mrf.mxu0  ;;  %v1998_v45 = vadd.f32 %v1997_v20, %v1804_v34 }
 0x1cf   : > { %v1999_v44 = vpop.f32.mrf.mxu1 }
 0x1d0   : > { %2494 = vst.msk [vmem:[%s3942_s26 + $0xf8] sm:$0xff] %vm4002_vm2, %v2887_v35  ;;  %v2000_v24 = vadd.f32 %v1999_v44, %v1806_v22  ;;  %v1808_v36 = vpop.f32.mrf.mxu0 }
 0x1d1   : > { %v2001_v37 = vpop.f32.mrf.mxu1 }
 0x1d2   : > { %v2889_v39 = vpack.c.bf16 %v2000_v24, %v1998_v45  ;;  %v1810_v40 = vpop.f32.mrf.mxu0  ;;  %v2002_v53 = vadd.f32 %v2001_v37, %v1808_v36 }
 0x1d3   : > { %v2003_v48 = vpop.f32.mrf.mxu1 }
 0x1d4   : > { %2496 = vst.msk [vmem:[%s3942_s26 + $0x108] sm:$0xff] %vm4002_vm2, %v2889_v39  ;;  %v2004_v60 = vadd.f32 %v2003_v48, %v1810_v40  ;;  %v1814_v46 = vpop.f32.mrf.mxu0 }
 0x1d5   : > { %v2007_v61 = vpop.f32.mrf.mxu1 }
 0x1d6   : > { %v2891_v47 = vpack.c.bf16 %v2004_v60, %v2002_v53  ;;  %v1816_v62 = vpop.f32.mrf.mxu0  ;;  %v2008_v55 = vadd.f32 %v2007_v61, %v1814_v46 }
 0x1d7   : > { %v2009_v54 = vpop.f32.mrf.mxu1 }
 0x1d8   : > { %2498 = vst.msk [vmem:[%s3942_s26 + $0x118] sm:$0xff] %vm4002_vm2, %v2891_v47  ;;  %v2010_v63 = vadd.f32 %v2009_v54, %v1816_v62  ;;  %v1818_v2 = vpop.f32.mrf.mxu0 }
 0x1d9   : > { %v2011_v10 = vpop.f32.mrf.mxu1 }
 0x1da   : > { %v2893_v11 = vpack.c.bf16 %v2010_v63, %v2008_v55  ;;  %v1820_v12 = vpop.f32.mrf.mxu0  ;;  %v2012_v49 = vadd.f32 %v2011_v10, %v1818_v2 }
 0x1db   : > { %v2013_v13 = vpop.f32.mrf.mxu1 }
 0x1dc   : > { %2500 = vst.msk [vmem:[%s3942_s26 + $0x128] sm:$0xff] %vm4002_vm2, %v2893_v11  ;;  %v2014_v51 = vadd.f32 %v2013_v13, %v1820_v12  ;;  %v1824_v4 = vpop.f32.mrf.mxu0 }
 0x1dd   : > { %v2017_v5 = vpop.f32.mrf.mxu1 }
 0x1de   : > { %v2895_v58 = vpack.c.bf16 %v2014_v51, %v2012_v49  ;;  %v1826_v8 = vpop.f32.mrf.mxu0  ;;  %v2018_v9 = vadd.f32 %v2017_v5, %v1824_v4 }
 0x1df   : > { %v2019_v59 = vpop.f32.mrf.mxu1 }
 0x1e0   : > { %2502 = vst.msk [vmem:[%s3942_s26 + $0x138] sm:$0xff] %vm4002_vm2, %v2895_v58  ;;  %v2020_v16 = vadd.f32 %v2019_v59, %v1826_v8  ;;  %v1828_v14 = vpop.f32.mrf.mxu0 }
 0x1e1   : > { %v2021_v17 = vpop.f32.mrf.mxu1 }
 0x1e2   : > { %v2897_v21 = vpack.c.bf16 %v2020_v16, %v2018_v9  ;;  %v1830_v18 = vpop.f32.mrf.mxu0  ;;  %v2022_v27 = vadd.f32 %v2021_v17, %v1828_v14 }
 0x1e3   : > { %v2023_v23 = vpop.f32.mrf.mxu1 }
 0x1e4   : > { %2504 = vst.msk [vmem:[%s3942_s26 + $0x148] sm:$0xff] %vm4002_vm2, %v2897_v21  ;;  %v2024_v19 = vadd.f32 %v2023_v23, %v1830_v18  ;;  %v1834_v25 = vpop.f32.mrf.mxu0 }
 0x1e5   : > { %v2027_v26 = vpop.f32.mrf.mxu1 }
 0x1e6   : > { %v2899_v30 = vpack.c.bf16 %v2024_v19, %v2022_v27  ;;  %v1836_v31 = vpop.f32.mrf.mxu0  ;;  %v2028_v41 = vadd.f32 %v2027_v26, %v1834_v25 }
 0x1e7   : > { %v2029_v38 = vpop.f32.mrf.mxu1 }
 0x1e8   : > { %2506 = vst.msk [vmem:[%s3942_s26 + $0x158] sm:$0xff] %vm4002_vm2, %v2899_v30  ;;  %v2030_v42 = vadd.f32 %v2029_v38, %v1836_v31  ;;  %v1838_v28 = vpop.f32.mrf.mxu0 }
 0x1e9   : > { %v2031_v43 = vpop.f32.mrf.mxu1 }
 0x1ea   : > { %v2901_v29 = vpack.c.bf16 %v2030_v42, %v2028_v41  ;;  %v1840_v50 = vpop.f32.mrf.mxu0  ;;  %v2032_v33 = vadd.f32 %v2031_v43, %v1838_v28 }
 0x1eb   : > { %v2033_v32 = vpop.f32.mrf.mxu1 }
 0x1ec   : > { %2508 = vst.msk [vmem:[%s3942_s26 + $0x168] sm:$0xff] %vm4002_vm2, %v2901_v29  ;;  %v2034_v52 = vadd.f32 %v2033_v32, %v1840_v50  ;;  %v1844_v56 = vpop.f32.mrf.mxu0 }
 0x1ed   : > { %v2037_v57 = vpop.f32.mrf.mxu1 }
 0x1ee   : > { %v2903_v0 = vpack.c.bf16 %v2034_v52, %v2032_v33  ;;  %v1846_v3 = vpop.f32.mrf.mxu0  ;;  %v2038_v7 = vadd.f32 %v2037_v57, %v1844_v56 }
 0x1ef   : > { %v2039_v6 = vpop.f32.mrf.mxu1 }
 0x1f0   : > { %2510 = vst.msk [vmem:[%s3942_s26 + $0x178] sm:$0xff] %vm4002_vm2, %v2903_v0  ;;  %v2040_v15 = vadd.f32 %v2039_v6, %v1846_v3  ;;  %v1848_v34 = vpop.f32.mrf.mxu0 }
 0x1f1   : > { %v2041_v20 = vpop.f32.mrf.mxu1 }
 0x1f2   : > { %v2905_v35 = vpack.c.bf16 %v2040_v15, %v2038_v7  ;;  %v1850_v22 = vpop.f32.mrf.mxu0  ;;  %v2042_v45 = vadd.f32 %v2041_v20, %v1848_v34 }
 0x1f3   : > { %v2043_v44 = vpop.f32.mrf.mxu1 }
 0x1f4   : > { %2512 = vst.msk [vmem:[%s3942_s26 + $0x188] sm:$0xff] %vm4002_vm2, %v2905_v35  ;;  %v2044_v24 = vadd.f32 %v2043_v44, %v1850_v22  ;;  %v1854_v36 = vpop.f32.mrf.mxu0 }
 0x1f5   : > { %v2047_v37 = vpop.f32.mrf.mxu1 }
 0x1f6   : > { %v2907_v39 = vpack.c.bf16 %v2044_v24, %v2042_v45  ;;  %v1856_v40 = vpop.f32.mrf.mxu0  ;;  %v2048_v53 = vadd.f32 %v2047_v37, %v1854_v36 }
 0x1f7   : > { %v2049_v48 = vpop.f32.mrf.mxu1 }
 0x1f8   : > { %2514 = vst.msk [vmem:[%s3942_s26 + $0x198] sm:$0xff] %vm4002_vm2, %v2907_v39  ;;  %v2050_v60 = vadd.f32 %v2049_v48, %v1856_v40  ;;  %v1858_v46 = vpop.f32.mrf.mxu0 }
 0x1f9   : > { %v2051_v61 = vpop.f32.mrf.mxu1 }
 0x1fa   : > { %v2909_v47 = vpack.c.bf16 %v2050_v60, %v2048_v53  ;;  %v1860_v62 = vpop.f32.mrf.mxu0  ;;  %v2052_v55 = vadd.f32 %v2051_v61, %v1858_v46 }
 0x1fb   : > { %v2053_v54 = vpop.f32.mrf.mxu1 }
 0x1fc   : > { %2516 = vst.msk [vmem:[%s3942_s26 + $0x1a8] sm:$0xff] %vm4002_vm2, %v2909_v47  ;;  %v2054_v63 = vadd.f32 %v2053_v54, %v1860_v62  ;;  %v1864_v2 = vpop.f32.mrf.mxu0 }
 0x1fd   : > { %v2057_v10 = vpop.f32.mrf.mxu1 }
 0x1fe   : > { %v2911_v11 = vpack.c.bf16 %v2054_v63, %v2052_v55  ;;  %v1866_v12 = vpop.f32.mrf.mxu0  ;;  %v2058_v49 = vadd.f32 %v2057_v10, %v1864_v2 }
 0x1ff   : > { %v2059_v13 = vpop.f32.mrf.mxu1 }
 0x200   : > { %2518 = vst.msk [vmem:[%s3942_s26 + $0x1b8] sm:$0xff] %vm4002_vm2, %v2911_v11  ;;  %v2060_v51 = vadd.f32 %v2059_v13, %v1866_v12  ;;  %v1868_v4 = vpop.f32.mrf.mxu0 }
 0x201   : > { %v2061_v5 = vpop.f32.mrf.mxu1 }
 0x202   : > { %v2913_v58 = vpack.c.bf16 %v2060_v51, %v2058_v49  ;;  %v1870_v8 = vpop.f32.mrf.mxu0  ;;  %v2062_v9 = vadd.f32 %v2061_v5, %v1868_v4 }
 0x203   : > { %v2063_v59 = vpop.f32.mrf.mxu1 }
 0x204   : > { %2520 = vst.msk [vmem:[%s3942_s26 + $0x1c8] sm:$0xff] %vm4002_vm2, %v2913_v58  ;;  %v2064_v16 = vadd.f32 %v2063_v59, %v1870_v8  ;;  %v1874_v14 = vpop.f32.mrf.mxu0 }
 0x205   : > { %v2067_v17 = vpop.f32.mrf.mxu1 }
 0x206   : > { %v2915_v21 = vpack.c.bf16 %v2064_v16, %v2062_v9  ;;  %v1876_v18 = vpop.f32.mrf.mxu0  ;;  %v2068_v27 = vadd.f32 %v2067_v17, %v1874_v14 }
 0x207   : > { %v2069_v23 = vpop.f32.mrf.mxu1 }
 0x208   : > { %2522 = vst.msk [vmem:[%s3942_s26 + $0x1d8] sm:$0xff] %vm4002_vm2, %v2915_v21  ;;  %v2070_v19 = vadd.f32 %v2069_v23, %v1876_v18  ;;  %v1878_v25 = vpop.f32.mrf.mxu0 }
 0x209   : > { %v2071_v26 = vpop.f32.mrf.mxu1 }
 0x20a   : > { %v2917_v30 = vpack.c.bf16 %v2070_v19, %v2068_v27  ;;  %v1880_v31 = vpop.f32.mrf.mxu0  ;;  %v2072_v41 = vadd.f32 %v2071_v26, %v1878_v25 }
 0x20b   : > { %v2073_v38 = vpop.f32.mrf.mxu1 }
 0x20c   : > { %2524 = vst.msk [vmem:[%s3942_s26 + $0x1e8] sm:$0xff] %vm4002_vm2, %v2917_v30  ;;  %v2074_v42 = vadd.f32 %v2073_v38, %v1880_v31 }
 0x20e   : > { %v2919_v28 = vpack.c.bf16 %v2074_v42, %v2072_v41 }
 0x210   : > { %2526 = vst.msk [vmem:[%s3942_s26 + $0x1f8] sm:$0xff] %vm4002_vm2, %v2919_v28 }
 0x211 PF: > { %s12_s9 = sadd.s32 1, %s3222_s9  }
 0x212   : > { %p9_p4 = scmp.ge.s32.totalorder %s12_s9, 4  }
 0x214   :  { %11 = sbr.rel (!%p9_p4) target bundleno = 1 (0x1), region = 58 }

// kernel: spatial_model_forward.3
= control target key start
LH: loop header
LB: loop body
LE: loop exit
PB: predicated region body
PF: predicated region fallthrough
CT: control target
= control target key end

     0   :  { %s2000_s12 = smov 0   ;;  %s2477_s0 = inlined_call_operand.vmem [shape: bf16[2,35,64,64], index: 0, kind: input, shape index: {}]   ;;  %s2478_s1 = inlined_call_operand.vmem [shape: bf16[64,1920], index: 1, kind: input, shape index: {}]   ;;  %s2479_s2 = inlined_call_operand.vmem [shape: bf16[35,2,1920], index: 2, kind: input, shape index: {}]   ;;  %s2480_s3 = inlined_call_operand.vmem [shape: f32[2,1,2], index: 3, kind: output, shape index: {}]  }
   0x1 LB: > { %s1704_s13 = sadd.s32 4294967295, %s1968_s12   ;;  %p1708_p0 = scmp.ge.s32.totalorder %s1968_s12, 1  ;;  %s1968_s12 = sphi %s2000_s12, %s13_s12  }
   0x2   : > { %p137_p1 = scmp.lt.s32.totalorder %s1968_s12, 3 }
   0x4   : > { %p138_p2 = pnand %p1708_p0, %p137_p1 }
   0x5   : > { %p159_p3 = scmp.lt.s32.totalorder (!%p138_p2), %s1704_s13, 1  ;;  %s2022_s21 = smov (!%p138_p2), 0  }
   0x6   : > { %141 = sbr.rel (%p138_p2) target bundleno = 520 (0x208), region = 32 }
   0xb   : > { %s2483_s13 = smov (!%p159_p3, %s1704_s13), 1  ;;  %v2020_v0 = vmov 0.0  }
   0xc   : > { %s1835_s14 = smul.u32 1120, %s2483_s13  ;;  %s166_s17 = scalar_lea.vmem %s2480_s3, %s2483_s13 }
   0xe   : > { %s2018_s20 = scalar_lea.vmem %s2477_s0, %s1835_s14 }
   0xf LB: >> { %v1862_v1 = vld [vmem:[%s2478_s1 + $0x16c] ss:$60 sps:$4 sm:$0xff]   ;;  %v1864_v2 = vld [vmem:[%s2478_s1 + $0x174] ss:$60 sps:$4 sm:$0xff]   ;;  %v1978_v3 = vmov 0   ;;  %s1810_s15 = sshll.u32 %s1976_s21, 5  ;;  %s1976_s21 = sphi %s2022_s21, %s173_s21   ;;  %v1972_v0 = vphi %v2020_v0, %v2481_v0  }
  0x10   : >> { %619 = vmatprep.mubr.bf16.mxu0 %v1978_v3  ;;  %692 = vmatprep.mubr.bf16.mxu1 %v1978_v3  ;;  %v1866_v4 = vld [vmem:[%s2478_s1 + $0x168] ss:$60 sps:$4 sm:$0xff]   ;;  %v1867_v5 = vld [vmem:[%s2478_s1 + $0x170] ss:$60 sps:$4 sm:$0xff]   ;;  %v1870_v7 = vld [vmem:[%s2478_s1 + $0xfc] ss:$60 sps:$4 sm:$0xff]   ;;  %s2076_s29 = scalar_lea.vmem %s2018_s20, %s1810_s15 }
  0x11   : >> { %595 = vmatprep.subr.bf16.mxu0 %v1862_v1  ;;  %668 = vmatprep.subr.bf16.mxu1 %v1864_v2  ;;  %v1868_v6 = vld [vmem:[%s2478_s1 + $0xf4] ss:$60 sps:$4 sm:$0xff]   ;;  %v1874_v10 = vld [vmem:[%s2478_s1 + $0x7c] ss:$60 sps:$4 sm:$0xff]   ;;  %v1876_v11 = vld [vmem:[%s2478_s1 + $0x84] ss:$60 sps:$4 sm:$0xff]  }
  0x12   : >> { %596 = vmatpush1.bf16.msra.mxu0 %v1866_v4  ;;  %669 = vmatpush1.bf16.msra.mxu1 %v1867_v5  ;;  %v1872_v8 = vld [vmem:[%s2478_s1 + $0xf0] ss:$60 sps:$4 sm:$0xff]   ;;  %v1873_v9 = vld [vmem:[%s2478_s1 + $0xf8] ss:$60 sps:$4 sm:$0xff]   ;;  %v1879_v13 = vld [vmem:[%s2478_s1 + $0x80] ss:$60 sps:$4 sm:$0xff]  }
  0x13   : >> { %597 = vmatprep.subr.bf16.mxu0 %v1868_v6  ;;  %670 = vmatprep.subr.bf16.mxu1 %v1870_v7  ;;  %v1878_v12 = vld [vmem:[%s2478_s1 + $0x78] ss:$60 sps:$4 sm:$0xff]   ;;  %v1880_v14 = vld [vmem:[%s2478_s1 + $0x4] ss:$60 sps:$4 sm:$0xff]   ;;  %v1882_v15 = vld [vmem:[%s2478_s1 + $0xc] ss:$60 sps:$4 sm:$0xff]  }
  0x14   : >> { %v1884_v16 = vld [vmem:[%s2478_s1] ss:$60 sps:$4 sm:$0xff]   ;;  %v1885_v17 = vld [vmem:[%s2478_s1 + $0x8] ss:$60 sps:$4 sm:$0xff]   ;;  %vm574_vm0 = vcmask 523264   ;;  %v2154_v37 = vld [vmem:[%s2076_s29 + $0x10] sm:$0xff]  }
  0x15   : >> { %v1889_v18 = vld [vmem:[%s2478_s1 + $0x17c] ss:$60 sps:$4 sm:$0xff]   ;;  %v2088_v19 = vld [vmem:[%s2076_s29] sm:$0xff]   ;;  %v1903_v25 = vld [vmem:[%s2478_s1 + $0x10c] ss:$60 sps:$4 sm:$0xff]   ;;  %s1493_s8 = smul.u32 15, %s1976_s21 }
  0x16   : >> { %598 = vmatpush1.bf16.msra.mxu0 %v1872_v8  ;;  %671 = vmatpush1.bf16.msra.mxu1 %v1873_v9  ;;  %v1887_v20 = vld [vmem:[%s2478_s1 + $0x178] ss:$60 sps:$4 sm:$0xff]   ;;  %v1896_v21 = vld [vmem:[%s2478_s1 + $0x184] ss:$60 sps:$4 sm:$0xff]   ;;  %v1900_v26 = vld [vmem:[%s2478_s1 + $0x8c] ss:$60 sps:$4 sm:$0xff]  }
  0x17   : >> { %599 = vmatprep.subr.bf16.mxu0 %v1874_v10  ;;  %672 = vmatprep.subr.bf16.mxu1 %v1876_v11  ;;  %v1893_v22 = vld [vmem:[%s2478_s1 + $0x104] ss:$60 sps:$4 sm:$0xff]   ;;  %v2121_v28 = vld [vmem:[%s2076_s29 + $0x8] sm:$0xff]   ;;  %v1910_v30 = vld [vmem:[%s2478_s1 + $0x94] ss:$60 sps:$4 sm:$0xff]   ;;  %s2322_s11 = scalar_lea.vmem %s2479_s2, %s1493_s8  ;;  %vm1602_vm1 = vcmask 1041408  }
  0x18   : >> { %v1894_v23 = vld [vmem:[%s2478_s1 + $0x180] ss:$60 sps:$4 sm:$0xff]   ;;  %v1901_v27 = vld [vmem:[%s2478_s1 + $0x108] ss:$60 sps:$4 sm:$0xff]   ;;  %v1907_v31 = vld [vmem:[%s2478_s1 + $0x14] ss:$60 sps:$4 sm:$0xff]  }
  0x19   : >> { %v1891_v24 = vld [vmem:[%s2478_s1 + $0x100] ss:$60 sps:$4 sm:$0xff]   ;;  %v1898_v29 = vld [vmem:[%s2478_s1 + $0x88] ss:$60 sps:$4 sm:$0xff]   ;;  %v1908_v32 = vld [vmem:[%s2478_s1 + $0x90] ss:$60 sps:$4 sm:$0xff]  }
  0x1a   : >> { %600 = vmatpush1.bf16.msra.mxu0 %v1878_v12  ;;  %673 = vmatpush1.bf16.msra.mxu1 %v1879_v13  ;;  %v1913_v33 = vld [vmem:[%s2478_s1 + $0x1c] ss:$60 sps:$4 sm:$0xff]   ;;  %v1905_v34 = vld [vmem:[%s2478_s1 + $0x10] ss:$60 sps:$4 sm:$0xff]   ;;  %v1914_v40 = vld [vmem:[%s2478_s1 + $0x188] ss:$60 sps:$4 sm:$0xff]  }
  0x1b   : >> { %601 = vmatprep.subr.bf16.mxu0 %v1880_v14  ;;  %674 = vmatprep.subr.bf16.mxu1 %v1882_v15  ;;  %v1911_v35 = vld [vmem:[%s2478_s1 + $0x18] ss:$60 sps:$4 sm:$0xff]   ;;  %v1916_v36 = vld [vmem:[%s2478_s1 + $0x18c] ss:$60 sps:$4 sm:$0xff]   ;;  %v1934_v48 = vld [vmem:[%s2478_s1 + $0xa4] ss:$60 sps:$4 sm:$0xff]  }
  0x1c   : >> { %v1922_v38 = vld [vmem:[%s2478_s1 + $0x194] ss:$60 sps:$4 sm:$0xff]   ;;  %v2166_v39 = vld [vmem:[%s2076_s29 + $0x18] sm:$0xff]   ;;  %v1931_v49 = vld [vmem:[%s2478_s1 + $0x24] ss:$60 sps:$4 sm:$0xff]   ;;  %s173_s21 = sadd.s32 1, %s1976_s21  }
  0x1d   : >> { %v1919_v41 = vld [vmem:[%s2478_s1 + $0x114] ss:$60 sps:$4 sm:$0xff]   ;;  %v1928_v43 = vld [vmem:[%s2478_s1 + $0x11c] ss:$60 sps:$4 sm:$0xff]   ;;  %v1937_v51 = vld [vmem:[%s2478_s1 + $0x2c] ss:$60 sps:$4 sm:$0xff]  }
  0x1e   : >> { %602 = vmatpush1.bf16.msra.mxu0 %v1884_v16  ;;  %675 = vmatpush1.bf16.msra.mxu1 %v1885_v17  ;;  %v1920_v42 = vld [vmem:[%s2478_s1 + $0x190] ss:$60 sps:$4 sm:$0xff]   ;;  %v1925_v45 = vld [vmem:[%s2478_s1 + $0x9c] ss:$60 sps:$4 sm:$0xff]   ;;  %v1935_v53 = vld [vmem:[%s2478_s1 + $0x28] ss:$60 sps:$4 sm:$0xff]  }
  0x1f   : >> { %741 = vmatprep.subr.bf16.mxu0 %v1889_v18  ;;  %814 = vmatprep.subr.bf16.mxu1 %v1896_v21  ;;  %v1917_v44 = vld [vmem:[%s2478_s1 + $0x110] ss:$60 sps:$4 sm:$0xff]   ;;  %v1926_v46 = vld [vmem:[%s2478_s1 + $0x118] ss:$60 sps:$4 sm:$0xff]   ;;  %v1932_v50 = vld [vmem:[%s2478_s1 + $0xa0] ss:$60 sps:$4 sm:$0xff]  }
  0x20   : >> { %v1923_v47 = vld [vmem:[%s2478_s1 + $0x98] ss:$60 sps:$4 sm:$0xff]   ;;  %v1929_v52 = vld [vmem:[%s2478_s1 + $0x20] ss:$60 sps:$4 sm:$0xff]   ;;  %v1948_v58 = vld [vmem:[%s2478_s1 + $0x128] ss:$60 sps:$4 sm:$0xff]  }
  0x21   : >> { %1776 = vmatmul.mubr.msk.bf16.vlgmr.msra.gmra.mxu0 %vm574_vm0, %v2088_v19  ;;  %1780 = vmatmul.mubr.msk.bf16.vlgmr.msra.gmra.mxu1 %vm574_vm0, %v2088_v19  ;;  %v1940_v54 = vld [vmem:[%s2478_s1 + $0x19c] ss:$60 sps:$4 sm:$0xff]   ;;  %v1943_v57 = vld [vmem:[%s2478_s1 + $0x124] ss:$60 sps:$4 sm:$0xff]   ;;  %v1947_v60 = vld [vmem:[%s2478_s1 + $0xac] ss:$60 sps:$4 sm:$0xff]  }
  0x22   : >> { %742 = vmatpush1.bf16.msra.mxu0 %v1887_v20  ;;  %629 = vmatprep.mubr.bf16.mxu0 %v1978_v3  ;;  %v1944_v55 = vld [vmem:[%s2478_s1 + $0x1a0] ss:$60 sps:$4 sm:$0xff]   ;;  %v1938_v56 = vld [vmem:[%s2478_s1 + $0x198] ss:$60 sps:$4 sm:$0xff]   ;;  %v1945_v61 = vld [vmem:[%s2478_s1 + $0xa8] ss:$60 sps:$4 sm:$0xff]  }
  0x23   : >> { %702 = vmatprep.mubr.bf16.mxu1 %v1978_v3  ;;  %743 = vmatprep.subr.bf16.mxu0 %v1893_v22  ;;  %v1941_v59 = vld [vmem:[%s2478_s1 + $0x120] ss:$60 sps:$4 sm:$0xff]   ;;  %v1952_v62 = vld [vmem:[%s2478_s1 + $0xb0] ss:$60 sps:$4 sm:$0xff]   ;;  %v1953_v1 = vld [vmem:[%s2478_s1 + $0x38] ss:$60 sps:$4 sm:$0xff]  }
  0x24   : >> { %815 = vmatpush1.bf16.msra.mxu1 %v1894_v23  ;;  %v1951_v63 = vld [vmem:[%s2478_s1 + $0x34] ss:$60 sps:$4 sm:$0xff]   ;;  %p170_p4 = scmp.ge.s32.totalorder %s173_s21, 35  }
  0x25   : >> { %816 = vmatprep.subr.bf16.mxu1 %v1903_v25  ;;  %v1949_v2 = vld [vmem:[%s2478_s1 + $0x30] ss:$60 sps:$4 sm:$0xff]   ;;  %vm1643_vm2 = vcmask (%p170_p4), 8192  }
  0x26   : >> { %744 = vmatpush1.bf16.msra.mxu0 %v1891_v24 }
  0x27   : >> { %745 = vmatprep.subr.bf16.mxu0 %v1900_v26 }
  0x28   : >> { %817 = vmatpush1.bf16.msra.mxu1 %v1901_v27 }
  0x29   : >> { %1777 = vmatmul.mubr.msk.bf16.gmra.mxu0 %vm574_vm0, %v2121_v28  ;;  %1781 = vmatmul.mubr.msk.bf16.gmra.mxu1 %vm574_vm0, %v2121_v28 }
  0x2a   : >> { %639 = vmatprep.mubr.bf16.mxu0 %v1978_v3  ;;  %712 = vmatprep.mubr.bf16.mxu1 %v1978_v3 }
  0x2b   : >> { %746 = vmatpush1.bf16.msra.mxu0 %v1898_v29  ;;  %818 = vmatprep.subr.bf16.mxu1 %v1910_v30 }
  0x2c   : >> { %747 = vmatprep.subr.bf16.mxu0 %v1907_v31  ;;  %819 = vmatpush1.bf16.msra.mxu1 %v1908_v32 }
  0x2d   : >> { %820 = vmatprep.subr.bf16.mxu1 %v1913_v33 }
  0x2f   : >> { %748 = vmatpush1.bf16.msra.mxu0 %v1905_v34 }
  0x30   : >> { %821 = vmatpush1.bf16.msra.mxu1 %v1911_v35  ;;  %887 = vmatprep.subr.bf16.mxu0 %v1916_v36 }
  0x31   : >> { %1778 = vmatmul.mubr.msk.bf16.gmra.mxu0 %vm574_vm0, %v2154_v37  ;;  %1782 = vmatmul.mubr.msk.bf16.gmra.mxu1 %vm574_vm0, %v2154_v37 }
  0x32   : >> { %649 = vmatprep.mubr.bf16.mxu0 %v1978_v3  ;;  %722 = vmatprep.mubr.bf16.mxu1 %v1978_v3 }
  0x33   : >> { %960 = vmatprep.subr.bf16.mxu1 %v1922_v38 }
  0x39   : >> { %1779 = vmatmul.mubr.msk.bf16.gmra.mxu0 %vm574_vm0, %v2166_v39  ;;  %1783 = vmatmul.mubr.msk.bf16.gmra.mxu1 %vm574_vm0, %v2166_v39 }
  0x3a   : >> { %765 = vmatprep.mubr.bf16.mxu0 %v1978_v3  ;;  %838 = vmatprep.mubr.bf16.mxu1 %v1978_v3 }
  0x41   : >> { %1784 = vmatmul.mubr.msk.bf16.vlgmr.msra.gmra.mxu0 %vm574_vm0, %v2088_v19  ;;  %1788 = vmatmul.mubr.msk.bf16.vlgmr.msra.gmra.mxu1 %vm574_vm0, %v2088_v19 }
  0x42   : >> { %888 = vmatpush1.bf16.msra.mxu0 %v1914_v40  ;;  %775 = vmatprep.mubr.bf16.mxu0 %v1978_v3 }
  0x43   : >> { %848 = vmatprep.mubr.bf16.mxu1 %v1978_v3  ;;  %889 = vmatprep.subr.bf16.mxu0 %v1919_v41 }
  0x44   : >> { %961 = vmatpush1.bf16.msra.mxu1 %v1920_v42 }
  0x45   : >> { %962 = vmatprep.subr.bf16.mxu1 %v1928_v43 }
  0x46   : >> { %890 = vmatpush1.bf16.msra.mxu0 %v1917_v44 }
  0x47   : >> { %891 = vmatprep.subr.bf16.mxu0 %v1925_v45 }
  0x48   : >> { %963 = vmatpush1.bf16.msra.mxu1 %v1926_v46 }
  0x49   : >> { %1785 = vmatmul.mubr.msk.bf16.gmra.mxu0 %vm574_vm0, %v2121_v28  ;;  %1789 = vmatmul.mubr.msk.bf16.gmra.mxu1 %vm574_vm0, %v2121_v28 }
  0x4a   : >> { %785 = vmatprep.mubr.bf16.mxu0 %v1978_v3  ;;  %858 = vmatprep.mubr.bf16.mxu1 %v1978_v3 }
  0x4b   : >> { %892 = vmatpush1.bf16.msra.mxu0 %v1923_v47  ;;  %964 = vmatprep.subr.bf16.mxu1 %v1934_v48 }
  0x4c   : >> { %893 = vmatprep.subr.bf16.mxu0 %v1931_v49  ;;  %965 = vmatpush1.bf16.msra.mxu1 %v1932_v50 }
  0x4d   : >> { %966 = vmatprep.subr.bf16.mxu1 %v1937_v51 }
  0x4f   : >> { %894 = vmatpush1.bf16.msra.mxu0 %v1929_v52 }
  0x50   : >> { %967 = vmatpush1.bf16.msra.mxu1 %v1935_v53  ;;  %1033 = vmatprep.subr.bf16.mxu0 %v1940_v54 }
  0x51   : >> { %1786 = vmatmul.mubr.msk.bf16.gmra.mxu0 %vm574_vm0, %v2154_v37  ;;  %1790 = vmatmul.mubr.msk.bf16.gmra.mxu1 %vm574_vm0, %v2154_v37 }
  0x52   : >> { %795 = vmatprep.mubr.bf16.mxu0 %v1978_v3  ;;  %868 = vmatprep.mubr.bf16.mxu1 %v1978_v3 }
  0x53   : >> { %1819 = vmatprep.subr.bf16.mxu1 %v1944_v55 }
  0x59   : >> { %1787 = vmatmul.mubr.msk.bf16.gmra.mxu0 %vm574_vm0, %v2166_v39  ;;  %1791 = vmatmul.mubr.msk.bf16.gmra.mxu1 %vm574_vm0, %v2166_v39 }
  0x5a   : >> { %911 = vmatprep.mubr.bf16.mxu0 %v1978_v3  ;;  %984 = vmatprep.mubr.bf16.mxu1 %v1978_v3 }
  0x61   : >> { %1792 = vmatmul.mubr.msk.bf16.vlgmr.msra.gmra.mxu0 %vm574_vm0, %v2088_v19  ;;  %1796 = vmatmul.mubr.msk.bf16.vlgmr.msra.gmra.mxu1 %vm574_vm0, %v2088_v19 }
  0x62   : >> { %1034 = vmatpush1.bf16.msra.mxu0 %v1938_v56  ;;  %921 = vmatprep.mubr.bf16.mxu0 %v1978_v3 }
  0x63   : >> { %994 = vmatprep.mubr.bf16.mxu1 %v1978_v3  ;;  %1035 = vmatprep.subr.bf16.mxu0 %v1943_v57 }
  0x64   : >> { %1820 = vmatpush3.bf16.msra.mxu1 %v1944_v55 }
  0x65   : >> { %1821 = vmatprep.subr.bf16.mxu1 %v1948_v58 }
  0x66   : >> { %1036 = vmatpush1.bf16.msra.mxu0 %v1941_v59 }
  0x67   : >> { %1037 = vmatprep.subr.bf16.mxu0 %v1947_v60 }
  0x68   : >> { %1822 = vmatpush3.bf16.msra.mxu1 %v1948_v58 }
  0x69   : >> { %1793 = vmatmul.mubr.msk.bf16.gmra.mxu0 %vm574_vm0, %v2121_v28  ;;  %1797 = vmatmul.mubr.msk.bf16.gmra.mxu1 %vm574_vm0, %v2121_v28 }
  0x6a   : >> { %931 = vmatprep.mubr.bf16.mxu0 %v1978_v3  ;;  %1004 = vmatprep.mubr.bf16.mxu1 %v1978_v3 }
  0x6b   : >> { %1038 = vmatpush1.bf16.msra.mxu0 %v1945_v61  ;;  %1823 = vmatprep.subr.bf16.mxu1 %v1952_v62 }
  0x6c   : >> { %1039 = vmatprep.subr.bf16.mxu0 %v1951_v63  ;;  %1824 = vmatpush3.bf16.msra.mxu1 %v1952_v62 }
  0x6d   : >> { %1825 = vmatprep.subr.bf16.mxu1 %v1953_v1 }
  0x6f   : >> { %1040 = vmatpush1.bf16.msra.mxu0 %v1949_v2 }
  0x70   : >> { %1826 = vmatpush3.bf16.msra.mxu1 %v1953_v1 }
  0x71   : >> { %1794 = vmatmul.mubr.msk.bf16.gmra.mxu0 %vm574_vm0, %v2154_v37  ;;  %1798 = vmatmul.mubr.msk.bf16.gmra.mxu1 %vm574_vm0, %v2154_v37 }
  0x72   : >> { %941 = vmatprep.mubr.bf16.mxu0 %v1978_v3  ;;  %1014 = vmatprep.mubr.bf16.mxu1 %v1978_v3 }
  0x79   : >> { %1795 = vmatmul.mubr.msk.bf16.gmra.mxu0 %vm574_vm0, %v2166_v39  ;;  %1799 = vmatmul.mubr.msk.bf16.gmra.mxu1 %vm574_vm0, %v2166_v39 }
  0x7a   : >> { %1057 = vmatprep.mubr.bf16.mxu0 %v1978_v3  ;;  %1827 = vmatprep.mubr.msk.bf16.mxu1 %vm574_vm0, %v2088_v19 }
  0x81   : >> { %1800 = vmatmul.mubr.msk.bf16.vlgmr.msra.gmra.mxu0 %vm574_vm0, %v2088_v19  ;;  %1828 = vmatmul.mubr.msk.bf16.vlgmr.msra.gmra.mxu1 %vm574_vm0, %v2121_v28 }
  0x82   : >> { %1067 = vmatprep.mubr.bf16.mxu0 %v1978_v3  ;;  %1831 = vmatprep.mubr.msk.bf16.mxu1 %vm574_vm0, %v2154_v37 }
  0x89   : >> { %1801 = vmatmul.mubr.msk.bf16.gmra.mxu0 %vm574_vm0, %v2121_v28  ;;  %1832 = vmatmul.mubr.msk.bf16.gmra.mxu1 %vm574_vm0, %v2166_v39 }
  0x8a   : >> { %1077 = vmatprep.mubr.bf16.mxu0 %v1978_v3 }
  0x91   : >> { %1802 = vmatmul.mubr.msk.bf16.gmra.mxu0 %vm574_vm0, %v2154_v37 }
  0x92   : >> { %1087 = vmatprep.mubr.bf16.mxu0 %v1978_v3 }
  0x99   : >> { %1803 = vmatmul.mubr.msk.bf16.gmra.mxu0 %vm574_vm0, %v2166_v39 }
  0xe1   : >> { %v621_v4 = vpop.f32.mrf.mxu0  ;;  %v694_v5 = vpop.f32.mrf.mxu1 }
  0xe2   : >> { %v1165_v8 = vmax.f32 %v694_v5, 0.0  ;;  %v1163_v11 = vmax.f32 %v621_v4, 0.0 }
  0xe3   : >> { %v623_v6 = vpop.f32.mrf.mxu0  ;;  %v696_v7 = vpop.f32.mrf.mxu1 }
  0xe4   : >> { %v1166_v12 = vmax.f32 %v696_v7, 0.0  ;;  %v1164_v15 = vmax.f32 %v623_v6, 0.0 }
  0xe5   : >> { %v625_v9 = vpop.f32.mrf.mxu0  ;;  %v698_v10 = vpop.f32.mrf.mxu1 }
  0xe6   : >> { %v1178_v13 = vmax.f32 %v625_v9, 0.0  ;;  %v1180_v14 = vmax.f32 %v698_v10, 0.0 }
  0xe7   : >> { %v627_v16 = vpop.f32.mrf.mxu0  ;;  %v700_v17 = vpop.f32.mrf.mxu1 }
  0xe8   : >> { %v1283_v18 = vadd.f32 %v1178_v13, %v1163_v11  ;;  %v1309_v19 = vadd.f32 %v1180_v14, %v1165_v8  ;;  %v1179_v3 = vmax.f32 %v627_v16, 0.0  ;;  %v1181_v20 = vmax.f32 %v700_v17, 0.0 }
  0xe9   : >> { %v631_v21 = vpop.f32.mrf.mxu0  ;;  %v704_v22 = vpop.f32.mrf.mxu1 }
  0xea   : >> { %v1296_v23 = vadd.f32 %v1179_v3, %v1164_v15  ;;  %v1322_v24 = vadd.f32 %v1181_v20, %v1166_v12  ;;  %v1193_v25 = vmax.f32 %v631_v21, 0.0  ;;  %v1195_v26 = vmax.f32 %v704_v22, 0.0 }
  0xeb   : >> { %v633_v27 = vpop.f32.mrf.mxu0  ;;  %v706_v28 = vpop.f32.mrf.mxu1  ;;  %v1979_v3 = vmov 1983009808   ;;  %v1509_v21 = vlaneseq }
  0xec   : >> { %v1284_v29 = vadd.f32 %v1283_v18, %v1193_v25  ;;  %v1310_v30 = vadd.f32 %v1309_v19, %v1195_v26  ;;  %v1194_v31 = vmax.f32 %v633_v27, 0.0  ;;  %v1196_v32 = vmax.f32 %v706_v28, 0.0 }
  0xed   : >> { %v635_v33 = vpop.f32.mrf.mxu0  ;;  %v708_v34 = vpop.f32.mrf.mxu1  ;;  %v1507_v20 = vunpack.c.l.s4 %v1979_v3 }
  0xee   : >> { %v1297_v35 = vadd.f32 %v1296_v23, %v1194_v31  ;;  %v1323_v36 = vadd.f32 %v1322_v24, %v1196_v32  ;;  %v1208_v37 = vmax.f32 %v635_v33, 0.0  ;;  %v1210_v38 = vmax.f32 %v708_v34, 0.0 }
  0xef   : >> { %v637_v39 = vpop.f32.mrf.mxu0  ;;  %v710_v40 = vpop.f32.mrf.mxu1  ;;  %v1508_v34 = vunpack.c.0.s8 %v1507_v20 }
  0xf0   : >> { %v1285_v41 = vadd.f32 %v1284_v29, %v1208_v37  ;;  %v1311_v42 = vadd.f32 %v1310_v30, %v1210_v38  ;;  %v1209_v43 = vmax.f32 %v637_v39, 0.0  ;;  %v1211_v44 = vmax.f32 %v710_v40, 0.0  ;;  %v2325_v30 = vld [vmem:[%s2322_s11] sm:$0xff] }
  0xf1   : >> { %v641_v45 = vpop.f32.mrf.mxu0  ;;  %v714_v46 = vpop.f32.mrf.mxu1 }
  0xf2   : >> { %v1298_v47 = vadd.f32 %v1297_v35, %v1209_v43  ;;  %v1324_v48 = vadd.f32 %v1323_v36, %v1211_v44  ;;  %v1223_v49 = vmax.f32 %v641_v45, 0.0  ;;  %v1225_v50 = vmax.f32 %v714_v46, 0.0 }
  0xf3   : >> { %v643_v51 = vpop.f32.mrf.mxu0  ;;  %v716_v52 = vpop.f32.mrf.mxu1  ;;  %v2328_v35 = vshrl.u32 %v1509_v21, 7 }
  0xf4   : >> { %v1286_v53 = vadd.f32 %v1285_v41, %v1223_v49  ;;  %v1312_v54 = vadd.f32 %v1311_v42, %v1225_v50  ;;  %v1224_v55 = vmax.f32 %v643_v51, 0.0  ;;  %v1226_v56 = vmax.f32 %v716_v52, 0.0 }
  0xf5   : >> { %v645_v57 = vpop.f32.mrf.mxu0  ;;  %v718_v58 = vpop.f32.mrf.mxu1  ;;  %v1497_v42 = vunpack.c.l.bf16 %v2325_v30  ;;  %v2340_v49 = vsub.s32 %v1508_v34, %v2328_v35 }
  0xf6   : >> { %v1299_v59 = vadd.f32 %v1298_v47, %v1224_v55  ;;  %v1325_v60 = vadd.f32 %v1324_v48, %v1226_v56  ;;  %v1238_v61 = vmax.f32 %v645_v57, 0.0  ;;  %v1240_v62 = vmax.f32 %v718_v58, 0.0 }
  0xf7   : >> { %v647_v63 = vpop.f32.mrf.mxu0  ;;  %v720_v1 = vpop.f32.mrf.mxu1  ;;  %v1505_v56 = vcombine.high %v1497_v42, %v1497_v42 }
  0xf8   : >> { %v1287_v2 = vadd.f32 %v1286_v53, %v1238_v61  ;;  %v1313_v4 = vadd.f32 %v1312_v54, %v1240_v62  ;;  %v1239_v5 = vmax.f32 %v647_v63, 0.0  ;;  %v1241_v6 = vmax.f32 %v720_v1, 0.0 }
  0xf9   : >> { %v651_v7 = vpop.f32.mrf.mxu0  ;;  %v724_v8 = vpop.f32.mrf.mxu1  ;;  %v1512_v63 = vrot.slane %v1497_v42, %v2340_v49 }
  0xfa   : >> { %v1300_v9 = vadd.f32 %v1299_v59, %v1239_v5  ;;  %v1326_v10 = vadd.f32 %v1325_v60, %v1241_v6  ;;  %v1253_v11 = vmax.f32 %v651_v7, 0.0  ;;  %v1255_v12 = vmax.f32 %v724_v8, 0.0 }
  0xfb   : >> { %v653_v13 = vpop.f32.mrf.mxu0  ;;  %v726_v14 = vpop.f32.mrf.mxu1  ;;  %v1519_v8 = vrot.slane %v1505_v56, %v2340_v49 }
  0xfc   : >> { %v1288_v15 = vadd.f32 %v1287_v2, %v1253_v11  ;;  %v1314_v16 = vadd.f32 %v1313_v4, %v1255_v12  ;;  %v1254_v17 = vmax.f32 %v653_v13, 0.0  ;;  %v1256_v18 = vmax.f32 %v726_v14, 0.0 }
  0xfd   : >> { %v655_v19 = vpop.f32.mrf.mxu0  ;;  %v728_v22 = vpop.f32.mrf.mxu1 }
  0xfe   : >> { %v1301_v23 = vadd.f32 %v1300_v9, %v1254_v17  ;;  %v1327_v24 = vadd.f32 %v1326_v10, %v1256_v18  ;;  %v1268_v25 = vmax.f32 %v655_v19, 0.0  ;;  %v1270_v26 = vmax.f32 %v728_v22, 0.0 }
  0xff   : >> { %v657_v27 = vpop.f32.mrf.mxu0  ;;  %v730_v28 = vpop.f32.mrf.mxu1 }
 0x100   : >> { %v1289_v29 = vadd.f32 %v1288_v15, %v1268_v25  ;;  %v1315_v31 = vadd.f32 %v1314_v16, %v1270_v26  ;;  %v1269_v32 = vmax.f32 %v657_v27, 0.0  ;;  %v1271_v33 = vmax.f32 %v730_v28, 0.0 }
 0x101   : >> { %v2330_v36 = vpop.f32.mrf.mxu0  ;;  %v2332_v37 = vpop.f32.mrf.mxu1  ;;  %v1520_v15 = vcombine.high %v1512_v63, %v1512_v63  ;;  %v1521_v28 = vcombine.high %v1519_v8, %v1519_v8 }
 0x102   : >> { %v1290_v38 = vrot.slane %v1289_v29, 4  ;;  %v1316_v39 = vrot.slane %v1315_v31, 4  ;;  %v1302_v40 = vadd.f32 %v1301_v23, %v1269_v32  ;;  %v1328_v41 = vadd.f32 %v1327_v24, %v1271_v33 }
 0x103   : >> { %v2335_v43 = vpop.f32.mrf.mxu0  ;;  %v2337_v44 = vpop.f32.mrf.mxu1 }
 0x104   : >> { %v1291_v45 = vadd.f32 %v1290_v38, %v1289_v29  ;;  %v1317_v46 = vadd.f32 %v1316_v39, %v1315_v31  ;;  %v1303_v47 = vrot.slane %v1302_v40, 4  ;;  %v1329_v48 = vrot.slane %v1328_v41, 4 }
 0x105   : >> { %v771_v50 = vpop.f32.mrf.mxu0  ;;  %v2342_v51 = vpop.f32.mrf.mxu1  ;;  %v1167_v29 = vmax.f32 %v2330_v36, 0.0 }
 0x106   : >> { %v1292_v52 = vrot.slane %v1291_v45, 2  ;;  %v1318_v53 = vrot.slane %v1317_v46, 2  ;;  %v1304_v54 = vadd.f32 %v1303_v47, %v1302_v40  ;;  %v1330_v55 = vadd.f32 %v1329_v48, %v1328_v41 }
 0x107   : >> { %v773_v57 = vpop.f32.mrf.mxu0  ;;  %v2344_v58 = vpop.f32.mrf.mxu1  ;;  %v1182_v22 = vmax.f32 %v771_v50, 0.0  ;;  %v1168_v40 = vmax.f32 %v2335_v43, 0.0 }
 0x108   : >> { %v1293_v59 = vadd.f32 %v1292_v52, %v1291_v45  ;;  %v1319_v60 = vadd.f32 %v1318_v53, %v1317_v46  ;;  %v1305_v61 = vrot.slane %v1304_v54, 2  ;;  %v1331_v62 = vrot.slane %v1330_v55, 2 }
 0x109   : >> { %v777_v1 = vpop.f32.mrf.mxu0  ;;  %v2347_v2 = vpop.f32.mrf.mxu1  ;;  %v1183_v31 = vmax.f32 %v773_v57, 0.0  ;;  %v1335_v41 = vadd.f32 %v1182_v22, %v1167_v29 }
 0x10a   : >> { %v1294_v4 = vrot.slane %v1293_v59, 1  ;;  %v1320_v5 = vrot.slane %v1319_v60, 1  ;;  %v1306_v6 = vadd.f32 %v1305_v61, %v1304_v54  ;;  %v1332_v7 = vadd.f32 %v1331_v62, %v1330_v55 }
 0x10b   : >> { %v779_v9 = vpop.f32.mrf.mxu0  ;;  %v2350_v10 = vpop.f32.mrf.mxu1  ;;  %v1197_v39 = vmax.f32 %v777_v1, 0.0  ;;  %v1348_v53 = vadd.f32 %v1183_v31, %v1168_v40  ;;  %v1169_v61 = vmax.f32 %v2332_v37, 0.0  ;;  %v1184_v62 = vmax.f32 %v2342_v51, 0.0 }
 0x10c   : >> { %v1295_v11 = vadd.f32 %v1294_v4, %v1293_v59  ;;  %v1321_v12 = vadd.f32 %v1320_v5, %v1319_v60  ;;  %v1307_v13 = vrot.slane %v1306_v6, 1  ;;  %v1333_v14 = vrot.slane %v1332_v7, 1 }
 0x10d   : >> { %v781_v16 = vpop.f32.mrf.mxu0  ;;  %v2352_v17 = vpop.f32.mrf.mxu1  ;;  %v1198_v42 = vmax.f32 %v779_v9, 0.0  ;;  %v1336_v57 = vadd.f32 %v1335_v41, %v1197_v39  ;;  %v1170_v51 = vmax.f32 %v2337_v44, 0.0  ;;  %v1200_v44 = vmax.f32 %v2350_v10, 0.0 }
 0x10e   : >> { %v1478_v18 = vmul.f32 0.020408163, %v1295_v11  ;;  %v1480_v19 = vmul.f32 0.020408163, %v1321_v12  ;;  %v1308_v3 = vadd.f32 %v1307_v13, %v1306_v6  ;;  %v1334_v20 = vadd.f32 %v1333_v14, %v1332_v7 }
 0x10f   : >> { %v783_v23 = vpop.f32.mrf.mxu0  ;;  %v2354_v24 = vpop.f32.mrf.mxu1  ;;  %v1212_v36 = vmax.f32 %v781_v16, 0.0  ;;  %v1361_v16 = vadd.f32 %v1184_v62, %v1169_v61 }
 0x110   : >> { %v1587_v25 = vmul.f32 %v1512_v63, %v1478_v18  ;;  %v1479_v26 = vmul.f32 0.020408163, %v1308_v3  ;;  %v1481_v27 = vmul.f32 0.020408163, %v1334_v20  ;;  %v1589_v34 = vmul.f32 %v1519_v8, %v1480_v19 }
 0x111   : >> { %v787_v32 = vpop.f32.mrf.mxu0  ;;  %v2357_v33 = vpop.f32.mrf.mxu1  ;;  %v1213_v43 = vmax.f32 %v783_v23, 0.0  ;;  %v1349_v63 = vadd.f32 %v1348_v53, %v1198_v42  ;;  %v1337_v6 = vadd.f32 %v1336_v57, %v1212_v36  ;;  %v1185_v18 = vmax.f32 %v2344_v58, 0.0 }
 0x112   : >> { %v1588_v38 = vmul.f32 %v1520_v15, %v1479_v26  ;;  %v1603_v47 = vsel %vm1602_vm1, %v1587_v25, 0.0  ;;  %v1590_v50 = vmul.f32 %v1521_v28, %v1481_v27  ;;  %v1606_v56 = vsel %vm1602_vm1, %v1589_v34, 0.0 }
 0x113   : >> { %v789_v45 = vpop.f32.mrf.mxu0  ;;  %v2360_v46 = vpop.f32.mrf.mxu1  ;;  %v1227_v59 = vmax.f32 %v787_v32, 0.0  ;;  %v1350_v13 = vadd.f32 %v1349_v63, %v1213_v43  ;;  %v1199_v19 = vmax.f32 %v2347_v2, 0.0  ;;  %v1374_v32 = vadd.f32 %v1185_v18, %v1170_v51 }
 0x114   : >> { %v1604_v48 = vsel %vm1602_vm1, %v1588_v38, 0.0  ;;  %v1608_v5 = vsel %vm1602_vm1, %v1590_v50, 0.0  ;;  %v1228_v7 = vmax.f32 %v789_v45, 0.0  ;;  %v1214_v58 = vmax.f32 %v2352_v17, 0.0 }
 0x115   : >> { %v1605_v52 = vadd.f32 %v1604_v48, %v1603_v47  ;;  %v791_v54 = vpop.f32.mrf.mxu0  ;;  %v2364_v55 = vpop.f32.mrf.mxu1  ;;  %v1338_v14 = vadd.f32 %v1337_v6, %v1227_v59  ;;  %v1362_v34 = vadd.f32 %v1361_v16, %v1199_v19  ;;  %v1375_v50 = vadd.f32 %v1374_v32, %v1200_v44 }
 0x116   : >> { %v1242_v8 = vmax.f32 %v791_v54, 0.0  ;;  %v1351_v22 = vadd.f32 %v1350_v13, %v1228_v7  ;;  %v1229_v53 = vmax.f32 %v2357_v33, 0.0  ;;  %v1230_v63 = vmax.f32 %v2360_v46, 0.0 }
 0x117   : >> { %v1607_v60 = vadd.f32 %v1606_v56, %v1605_v52  ;;  %v793_v1 = vpop.f32.mrf.mxu0  ;;  %v2369_v4 = vpop.f32.mrf.mxu1  ;;  %v1363_v36 = vadd.f32 %v1362_v34, %v1214_v58  ;;  %v1215_v52 = vmax.f32 %v2354_v24, 0.0  ;;  %v2398_v33 = vunpack.c.h.bf16 %v2325_v30 }
 0x118   : >> { %v1243_v15 = vmax.f32 %v793_v1, 0.0  ;;  %v1339_v23 = vadd.f32 %v1338_v14, %v1242_v8  ;;  %v1244_v1 = vmax.f32 %v2364_v55, 0.0  ;;  %v1245_v46 = vmax.f32 %v2369_v4, 0.0 }
 0x119   : >> { %v2372_v9 = vadd.f32 %v1608_v5, %v1607_v60  ;;  %v797_v11 = vpop.f32.mrf.mxu0  ;;  %v2374_v12 = vpop.f32.mrf.mxu1  ;;  %v1376_v61 = vadd.f32 %v1375_v50, %v1215_v52  ;;  %v1364_v62 = vadd.f32 %v1363_v36, %v1229_v53  ;;  %v1529_v14 = vrot.slane %v2398_v33, %v2340_v49 }
 0x11a   : >> { %v1257_v37 = vmax.f32 %v797_v11, 0.0  ;;  %v1352_v28 = vadd.f32 %v1351_v22, %v1243_v15  ;;  %v1259_v55 = vmax.f32 %v2374_v12, 0.0 }
 0x11b   : >> { %v799_v3 = vpop.f32.mrf.mxu0  ;;  %v2379_v20 = vpop.f32.mrf.mxu1  ;;  %v1365_v51 = vadd.f32 %v1364_v62, %v1244_v1 }
 0x11c   : >> { %v1258_v25 = vmax.f32 %v799_v3, 0.0  ;;  %v1340_v29 = vadd.f32 %v1339_v23, %v1257_v37  ;;  %v1377_v37 = vadd.f32 %v1376_v61, %v1230_v63 }
 0x11d   : >> { %v801_v26 = vpop.f32.mrf.mxu0  ;;  %v2381_v27 = vpop.f32.mrf.mxu1  ;;  %v1366_v32 = vadd.f32 %v1365_v51, %v1259_v55 }
 0x11e   : >> { %v1272_v31 = vmax.f32 %v801_v26, 0.0  ;;  %v1353_v39 = vadd.f32 %v1352_v28, %v1258_v25  ;;  %v1274_v34 = vmax.f32 %v2381_v27, 0.0 }
 0x11f   : >> { %v803_v38 = vpop.f32.mrf.mxu0  ;;  %v2385_v2 = vpop.f32.mrf.mxu1 }
 0x120   : >> { %v1341_v40 = vadd.f32 %v1340_v29, %v1272_v31  ;;  %v1273_v41 = vmax.f32 %v803_v38, 0.0  ;;  %v1537_v29 = vcombine.high %v1529_v14, %v1529_v14  ;;  %v1378_v31 = vadd.f32 %v1377_v37, %v1245_v46 }
 0x121   : >> { %v2387_v42 = vpop.f32.mrf.mxu0  ;;  %v986_v45 = vpop.f32.mrf.mxu1 }
 0x122   : >> { %v1342_v47 = vrot.slane %v1341_v40, 4  ;;  %v1354_v48 = vadd.f32 %v1353_v39, %v1273_v41  ;;  %v1173_v30 = vmax.f32 %v986_v45, 0.0  ;;  %v1260_v41 = vmax.f32 %v2379_v20, 0.0 }
 0x123   : >> { %v2391_v10 = vpop.f32.mrf.mxu0  ;;  %v2393_v17 = vpop.f32.mrf.mxu1  ;;  %v1171_v45 = vmax.f32 %v2387_v42, 0.0 }
 0x124   : >> { %v1343_v54 = vadd.f32 %v1342_v47, %v1341_v40  ;;  %v1355_v56 = vrot.slane %v1354_v48, 4  ;;  %v1174_v39 = vmax.f32 %v2393_v17, 0.0 }
 0x125   : >> { %v917_v57 = vpop.f32.mrf.mxu0  ;;  %v990_v43 = vpop.f32.mrf.mxu1 }
 0x126   : >> { %v1344_v59 = vrot.slane %v1343_v54, 2  ;;  %v1356_v60 = vadd.f32 %v1355_v56, %v1354_v48  ;;  %v1188_v22 = vmax.f32 %v990_v43, 0.0  ;;  %v1186_v44 = vmax.f32 %v917_v57, 0.0 }
 0x127   : >> { %v919_v5 = vpop.f32.mrf.mxu0  ;;  %v992_v24 = vpop.f32.mrf.mxu1  ;;  %v1367_v57 = vadd.f32 %v1366_v32, %v1274_v34  ;;  %v1172_v43 = vmax.f32 %v2391_v10, 0.0  ;;  %v1379_v10 = vadd.f32 %v1378_v31, %v1260_v41 }
 0x128   : >> { %v1345_v6 = vadd.f32 %v1344_v59, %v1343_v54  ;;  %v1357_v7 = vrot.slane %v1356_v60, 2  ;;  %v1189_v40 = vmax.f32 %v992_v24, 0.0  ;;  %v1413_v47 = vadd.f32 %v1188_v22, %v1173_v30 }
 0x129   : >> { %v923_v8 = vpop.f32.mrf.mxu0  ;;  %v996_v11 = vpop.f32.mrf.mxu1  ;;  %v1187_v27 = vmax.f32 %v919_v5, 0.0  ;;  %v1387_v17 = vadd.f32 %v1186_v44, %v1171_v45 }
 0x12a   : >> { %v1346_v13 = vrot.slane %v1345_v6, 1  ;;  %v1358_v15 = vadd.f32 %v1357_v7, %v1356_v60  ;;  %v1203_v48 = vmax.f32 %v996_v11, 0.0  ;;  %v1201_v54 = vmax.f32 %v923_v8, 0.0 }
 0x12b   : >> { %v925_v16 = vpop.f32.mrf.mxu0  ;;  %v998_v18 = vpop.f32.mrf.mxu1  ;;  %v1426_v42 = vadd.f32 %v1189_v40, %v1174_v39  ;;  %v1400_v8 = vadd.f32 %v1187_v27, %v1172_v43 }
 0x12c   : >> { %v1347_v19 = vadd.f32 %v1346_v13, %v1345_v6  ;;  %v1359_v3 = vrot.slane %v1358_v15, 1  ;;  %v1202_v61 = vmax.f32 %v925_v16, 0.0  ;;  %v1414_v1 = vadd.f32 %v1413_v47, %v1203_v48 }
 0x12d   : >> { %v927_v23 = vpop.f32.mrf.mxu0  ;;  %v1000_v25 = vpop.f32.mrf.mxu1  ;;  %v1204_v24 = vmax.f32 %v998_v18, 0.0 }
 0x12e   : >> { %v1482_v26 = vmul.f32 0.020408163, %v1347_v19  ;;  %v1360_v28 = vadd.f32 %v1359_v3, %v1358_v15  ;;  %v1216_v62 = vmax.f32 %v927_v23, 0.0  ;;  %v1218_v6 = vmax.f32 %v1000_v25, 0.0 }
 0x12f   : >> { %v929_v58 = vpop.f32.mrf.mxu0  ;;  %v1002_v4 = vpop.f32.mrf.mxu1  ;;  %v1275_v15 = vmax.f32 %v2385_v2, 0.0  ;;  %v1401_v46 = vadd.f32 %v1400_v8, %v1202_v61  ;;  %v1427_v3 = vadd.f32 %v1426_v42, %v1204_v24 }
 0x130   : >> { %v1591_v38 = vmul.f32 %v1529_v14, %v1482_v26  ;;  %v1483_v12 = vmul.f32 0.020408163, %v1360_v28  ;;  %v1217_v11 = vmax.f32 %v929_v58, 0.0  ;;  %v1368_v14 = vrot.slane %v1367_v57, 4 }
 0x131   : >> { %v933_v50 = vpop.f32.mrf.mxu0  ;;  %v1006_v36 = vpop.f32.mrf.mxu1  ;;  %v1415_v30 = vadd.f32 %v1414_v1, %v1218_v6  ;;  %v1219_v18 = vmax.f32 %v1002_v4, 0.0  ;;  %v1380_v44 = vadd.f32 %v1379_v10, %v1275_v15 }
 0x132   : >> { %v1610_v52 = vsel %vm1602_vm1, %v1591_v38, 0.0  ;;  %v1592_v53 = vmul.f32 %v1537_v29, %v1483_v12  ;;  %v1231_v13 = vmax.f32 %v933_v50, 0.0  ;;  %v1233_v22 = vmax.f32 %v1006_v36, 0.0 }
 0x133   : >> { %v1611_v56 = vadd.f32 %v1610_v52, %v2372_v9  ;;  %v935_v59 = vpop.f32.mrf.mxu0  ;;  %v1008_v60 = vpop.f32.mrf.mxu1  ;;  %v1388_v9 = vadd.f32 %v1387_v17, %v1201_v54  ;;  %v1402_v26 = vadd.f32 %v1401_v46, %v1217_v11  ;;  %v1369_v12 = vadd.f32 %v1368_v14, %v1367_v57 }
 0x134   : >> { %v1612_v20 = vsel %vm1602_vm1, %v1592_v53, 0.0  ;;  %v1232_v16 = vmax.f32 %v935_v59, 0.0  ;;  %v1428_v39 = vadd.f32 %v1427_v3, %v1219_v18  ;;  %v1416_v40 = vadd.f32 %v1415_v30, %v1233_v22 }
 0x135   : >> { %v2412_v63 = vadd.f32 %v1612_v20, %v1611_v56  ;;  %v937_v5 = vpop.f32.mrf.mxu0  ;;  %v1010_v7 = vpop.f32.mrf.mxu1  ;;  %v1389_v55 = vadd.f32 %v1388_v9, %v1216_v62  ;;  %v1234_v4 = vmax.f32 %v1008_v60, 0.0  ;;  %v1381_v27 = vrot.slane %v1380_v44, 4 }
 0x136   : >> { %v1246_v19 = vmax.f32 %v937_v5, 0.0  ;;  %v1403_v2 = vadd.f32 %v1402_v26, %v1232_v16  ;;  %v1248_v41 = vmax.f32 %v1010_v7, 0.0  ;;  %v1370_v17 = vrot.slane %v1369_v12, 2 }
 0x137   : >> { %v939_v37 = vpop.f32.mrf.mxu0  ;;  %v1012_v51 = vpop.f32.mrf.mxu1  ;;  %v1390_v28 = vadd.f32 %v1389_v55, %v1231_v13  ;;  %v1429_v61 = vadd.f32 %v1428_v39, %v1234_v4  ;;  %v1382_v7 = vadd.f32 %v1381_v27, %v1380_v44 }
 0x138   : >> { %v1247_v29 = vmax.f32 %v939_v37, 0.0  ;;  %v1417_v59 = vadd.f32 %v1416_v40, %v1248_v41  ;;  %v1249_v62 = vmax.f32 %v1012_v51, 0.0  ;;  %v1371_v15 = vadd.f32 %v1370_v17, %v1369_v12  ;;  %v2425_v12 = vld [vmem:[%s2322_s11 + $0x8] sm:$0x7f] }
 0x139   : >> { %v943_v23 = vpop.f32.mrf.mxu0  ;;  %v1016_v25 = vpop.f32.mrf.mxu1  ;;  %v1391_v58 = vadd.f32 %v1390_v28, %v1246_v19  ;;  %v1522_v37 = vcombine.high %v2398_v33, %v2398_v33  ;;  %v1383_v30 = vrot.slane %v1382_v7, 2 }
 0x13a   : >> { %v1261_v32 = vmax.f32 %v943_v23, 0.0  ;;  %v1404_v48 = vadd.f32 %v1403_v2, %v1247_v29  ;;  %v1263_v20 = vmax.f32 %v1016_v25, 0.0  ;;  %v1430_v46 = vadd.f32 %v1429_v61, %v1249_v62 }
 0x13b   : >> { %v945_v31 = vpop.f32.mrf.mxu0  ;;  %v1018_v34 = vpop.f32.mrf.mxu1  ;;  %v1384_v39 = vadd.f32 %v1383_v30, %v1382_v7 }
 0x13c   : >> { %v1262_v38 = vmax.f32 %v945_v31, 0.0  ;;  %v1392_v50 = vadd.f32 %v1391_v58, %v1261_v32  ;;  %v1264_v8 = vmax.f32 %v1018_v34, 0.0  ;;  %v1418_v9 = vadd.f32 %v1417_v59, %v1263_v20 }
 0x13d   : >> { %v947_v45 = vpop.f32.mrf.mxu0  ;;  %v1020_v47 = vpop.f32.mrf.mxu1  ;;  %v1372_v32 = vrot.slane %v1371_v15, 1  ;;  %v2422_v31 = vrot.slane %v1522_v37, %v2340_v49  ;;  %v1385_v17 = vrot.slane %v1384_v39, 1 }
 0x13e   : >> { %v1276_v36 = vmax.f32 %v947_v45, 0.0  ;;  %v1405_v54 = vadd.f32 %v1404_v48, %v1262_v38  ;;  %v1278_v60 = vmax.f32 %v1020_v47, 0.0  ;;  %v1431_v18 = vadd.f32 %v1430_v46, %v1264_v8 }
 0x13f   : >> { %v949_v52 = vpop.f32.mrf.mxu0  ;;  %v1022_v53 = vpop.f32.mrf.mxu1 }
 0x140   : >> { %v1393_v56 = vadd.f32 %v1392_v50, %v1276_v36  ;;  %v1277_v43 = vmax.f32 %v949_v52, 0.0  ;;  %v1419_v55 = vadd.f32 %v1418_v9, %v1278_v60  ;;  %v1279_v51 = vmax.f32 %v1022_v53, 0.0 }
 0x141   : >> { %v2415_v42 = vpop.f32.mrf.mxu0  ;;  %v1829_v57 = vpop.f32.mrf.mxu1  ;;  %v1373_v50 = vadd.f32 %v1372_v32, %v1371_v15  ;;  %v2428_v36 = vunpack.c.l.bf16 %v2425_v12  ;;  %v1538_v52 = vcombine.high %v2422_v31, %v2422_v31 }
 0x142   : >> { %v1394_v1 = vrot.slane %v1393_v56, 4  ;;  %v1406_v24 = vadd.f32 %v1405_v54, %v1277_v43  ;;  %v1207_v25 = vmax.f32 %v1829_v57, 0.0  ;;  %v1420_v33 = vrot.slane %v1419_v55, 4 }
 0x143   : >> { %v2417_v6 = vpop.f32.mrf.mxu0  ;;  %v1132_v5 = vpop.f32.mrf.mxu1  ;;  %v1432_v34 = vadd.f32 %v1431_v18, %v1279_v51  ;;  %v2434_v57 = vrot.slane %v2428_v36, %v2340_v49  ;;  %v1175_v7 = vmax.f32 %v2415_v42, 0.0 }
 0x144   : >> { %v1395_v11 = vadd.f32 %v1394_v1, %v1393_v56  ;;  %v1407_v13 = vrot.slane %v1406_v24, 4  ;;  %v1177_v16 = vmax.f32 %v1132_v5, 0.0  ;;  %v1421_v53 = vadd.f32 %v1420_v33, %v1419_v55 }
 0x145   : >> { %v1063_v10 = vpop.f32.mrf.mxu0  ;;  %v1830_v14 = vpop.f32.mrf.mxu1  ;;  %v1433_v27 = vrot.slane %v1432_v34, 4  ;;  %v1484_v5 = vmul.f32 0.020408163, %v1373_v50  ;;  %v1176_v37 = vmax.f32 %v2417_v6, 0.0 }
 0x146   : >> { %v1396_v22 = vrot.slane %v1395_v11, 2  ;;  %v1408_v23 = vadd.f32 %v1407_v13, %v1406_v24  ;;  %v1222_v44 = vmax.f32 %v1830_v14, 0.0  ;;  %v1190_v59 = vmax.f32 %v1063_v10, 0.0 }
 0x147   : >> { %v1065_v19 = vpop.f32.mrf.mxu0  ;;  %v1135_v3 = vpop.f32.mrf.mxu1  ;;  %v1434_v13 = vadd.f32 %v1433_v27, %v1432_v34 }
 0x148   : >> { %v1192_v26 = vmax.f32 %v1135_v3, 0.0  ;;  %v1397_v40 = vadd.f32 %v1396_v22, %v1395_v11  ;;  %v1409_v41 = vrot.slane %v1408_v23, 2  ;;  %v1191_v8 = vmax.f32 %v1065_v19, 0.0 }
 0x149   : >> { %v1069_v28 = vpop.f32.mrf.mxu0  ;;  %v1833_v29 = vpop.f32.mrf.mxu1  ;;  %v1422_v11 = vrot.slane %v1421_v53, 2  ;;  %v1439_v46 = vadd.f32 %v1190_v59, %v1175_v7 }
 0x14a   : >> { %v1465_v2 = vadd.f32 %v1192_v26, %v1177_v16  ;;  %v1398_v61 = vrot.slane %v1397_v40, 1  ;;  %v1410_v62 = vadd.f32 %v1409_v41, %v1408_v23  ;;  %v1267_v1 = vmax.f32 %v1833_v29, 0.0 }
 0x14b   : >> { %v1071_v58 = vpop.f32.mrf.mxu0  ;;  %v1148_v38 = vpop.f32.mrf.mxu1  ;;  %v1205_v9 = vmax.f32 %v1069_v28, 0.0  ;;  %v1386_v16 = vadd.f32 %v1385_v17, %v1384_v39  ;;  %v1452_v23 = vadd.f32 %v1191_v8, %v1176_v37  ;;  %v1593_v26 = vmul.f32 %v2422_v31, %v1484_v5 }
 0x14c   : >> { %v1466_v45 = vadd.f32 %v1465_v2, %v1207_v25  ;;  %v1237_v47 = vmax.f32 %v1148_v38, 0.0  ;;  %v1206_v55 = vmax.f32 %v1071_v58, 0.0  ;;  %v1399_v3 = vadd.f32 %v1398_v61, %v1397_v40 }
 0x14d   : >> { %v1073_v4 = vpop.f32.mrf.mxu0  ;;  %v1834_v48 = vpop.f32.mrf.mxu1  ;;  %v1411_v30 = vrot.slane %v1410_v62, 1  ;;  %v1440_v25 = vadd.f32 %v1439_v46, %v1205_v9  ;;  %v1423_v28 = vadd.f32 %v1422_v11, %v1421_v53  ;;  %v1435_v29 = vrot.slane %v1434_v13, 2 }
 0x14e   : >> { %v1467_v54 = vadd.f32 %v1466_v45, %v1222_v44  ;;  %v1282_v14 = vmax.f32 %v1834_v48, 0.0  ;;  %v1220_v51 = vmax.f32 %v1073_v4, 0.0  ;;  %v1453_v34 = vadd.f32 %v1452_v23, %v1206_v55 }
 0x14f   : >> { %v1075_v56 = vpop.f32.mrf.mxu0  ;;  %v1151_v43 = vpop.f32.mrf.mxu1  ;;  %v1485_v58 = vmul.f32 0.020408163, %v1386_v16  ;;  %v1486_v38 = vmul.f32 0.020408163, %v1399_v3  ;;  %v1412_v39 = vadd.f32 %v1411_v30, %v1410_v62  ;;  %v1424_v50 = vrot.slane %v1423_v28, 1 }
 0x150   : >> { %v1252_v20 = vmax.f32 %v1151_v43, 0.0  ;;  %v1468_v24 = vadd.f32 %v1467_v54, %v1237_v47  ;;  %v1221_v42 = vmax.f32 %v1075_v56, 0.0  ;;  %v1441_v6 = vadd.f32 %v1440_v25, %v1220_v51 }
 0x151   : >> { %v1079_v60 = vpop.f32.mrf.mxu0  ;;  %v1554_v53 = vcombine.high %v2434_v57, %v2434_v57  ;;  %v1436_v56 = vadd.f32 %v1435_v29, %v1434_v13  ;;  %v1594_v61 = vmul.f32 %v1538_v52, %v1485_v58  ;;  %v1487_v62 = vmul.f32 0.020408163, %v1412_v39 }
 0x152   : >> { %v1469_v15 = vadd.f32 %v1468_v24, %v1252_v20  ;;  %v1235_v19 = vmax.f32 %v1079_v60, 0.0  ;;  %v1454_v45 = vadd.f32 %v1453_v34, %v1221_v42  ;;  %v1614_v20 = vsel %vm1602_vm1, %v1593_v26, 0.0 }
 0x153   : >> { %v1081_v10 = vpop.f32.mrf.mxu0  ;;  %v1595_v24 = vmul.f32 %v2434_v57, %v1486_v38  ;;  %v1425_v9 = vadd.f32 %v1424_v50, %v1423_v28  ;;  %v1539_v13 = vcombine.high %v2428_v36, %v2428_v36  ;;  %v1616_v52 = vsel %vm1602_vm1, %v1594_v61, 0.0 }
 0x154   : >> { %v1470_v18 = vadd.f32 %v1469_v15, %v1267_v1  ;;  %v1236_v44 = vmax.f32 %v1081_v10, 0.0  ;;  %v1442_v47 = vadd.f32 %v1441_v6, %v1235_v19  ;;  %v1437_v15 = vrot.slane %v1436_v56, 1 }
 0x155   : >> { %v1083_v22 = vpop.f32.mrf.mxu0  ;;  %v1596_v46 = vmul.f32 %v1554_v53, %v1487_v62  ;;  %v1618_v16 = vsel %vm1602_vm1, %v1595_v24, 0.0  ;;  %v1553_v3 = vrot.slane %v1539_v13, %v2340_v49 }
 0x156   : >> { %v1471_v32 = vadd.f32 %v1470_v18, %v1282_v14  ;;  %v1250_v2 = vmax.f32 %v1083_v22, 0.0  ;;  %v1455_v43 = vadd.f32 %v1454_v45, %v1236_v44  ;;  %v1615_v14 = vadd.f32 %v1614_v20, %v2412_v63 }
 0x157   : >> { %v1085_v33 = vpop.f32.mrf.mxu0  ;;  %v1488_v18 = vmul.f32 0.020408163, %v1425_v9  ;;  %v1438_v22 = vadd.f32 %v1437_v15, %v1436_v56  ;;  %v1500_v63 = vunpack.c.h.bf16 %v2425_v12  ;;  %v1620_v28 = vsel %vm1602_vm1, %v1596_v46, 0.0 }
 0x158   : >> { %v1472_v40 = vrot.slane %v1471_v32, 4  ;;  %v1251_v4 = vmax.f32 %v1085_v33, 0.0  ;;  %v1443_v17 = vadd.f32 %v1442_v47, %v1250_v2  ;;  %v1617_v30 = vadd.f32 %v1616_v52, %v1615_v14 }
 0x159   : >> { %v1089_v41 = vpop.f32.mrf.mxu0  ;;  %v1555_v29 = vcombine.high %v1553_v3, %v1553_v3  ;;  %v1597_v6 = vmul.f32 %v1553_v3, %v1488_v18  ;;  %v1556_v44 = vcombine.high %v1500_v63, %v1500_v63  ;;  %v1637_v9 = vand.u32 (%p170_p4), 127, %v1509_v21 }
 0x15a   : >> { %v1265_v48 = vmax.f32 %v1089_v41, 0.0  ;;  %v1473_v27 = vadd.f32 %v1472_v40, %v1471_v32  ;;  %v1456_v60 = vadd.f32 %v1455_v43, %v1251_v4  ;;  %v1619_v25 = vadd.f32 %v1618_v16, %v1617_v30 }
 0x15b   : >> { %v1091_v54 = vpop.f32.mrf.mxu0  ;;  %v1489_v32 = vmul.f32 0.020408163, %v1438_v22  ;;  %v1563_v40 = vrot.slane %v1500_v63, %v2340_v49  ;;  %v1622_v47 = vsel %vm1602_vm1, %v1597_v6, 0.0  ;;  %v1570_v4 = vrot.slane %v1556_v44, %v2340_v49 }
 0x15c   : >> { %v1266_v59 = vmax.f32 %v1091_v54, 0.0  ;;  %v1444_v5 = vadd.f32 %v1443_v17, %v1265_v48  ;;  %v1474_v8 = vrot.slane %v1473_v27, 2  ;;  %v1621_v2 = vadd.f32 %v1620_v28, %v1619_v25 }
 0x15d   : >> { %v1093_v1 = vpop.f32.mrf.mxu0  ;;  %v1598_v45 = vmul.f32 %v1555_v29, %v1489_v32  ;;  %v1571_v53 = vcombine.high %v1563_v40, %v1563_v40 }
 0x15e   : >> { %v1280_v7 = vmax.f32 %v1093_v1, 0.0  ;;  %v1457_v10 = vadd.f32 %v1456_v60, %v1266_v59  ;;  %v1475_v51 = vadd.f32 %v1474_v8, %v1473_v27  ;;  %v1623_v48 = vadd.f32 %v1622_v47, %v1621_v2 }
 0x15f   : >> { %v1095_v11 = vpop.f32.mrf.mxu0  ;;  %v1624_v17 = vsel %vm1602_vm1, %v1598_v45, 0.0 }
 0x160   : >> { %v1445_v37 = vadd.f32 %v1444_v5, %v1280_v7  ;;  %v1281_v31 = vmax.f32 %v1095_v11, 0.0  ;;  %v1476_v26 = vrot.slane %v1475_v51, 1  ;;  %v1625_v59 = vadd.f32 %v1624_v17, %v1623_v48 }
 0x161   : > { %v1640_v11 = vsub.s32 (%p170_p4), %v1637_v9, %v2328_v35 }
 0x162   : >> { %v1446_v55 = vrot.slane %v1445_v37, 4  ;;  %v1458_v57 = vadd.f32 %v1457_v10, %v1281_v31  ;;  %v1477_v39 = vadd.f32 %v1476_v26, %v1475_v51 }
 0x164   : >> { %v1447_v36 = vadd.f32 %v1446_v55, %v1445_v37  ;;  %v1459_v23 = vrot.slane %v1458_v57, 4  ;;  %v1492_v54 = vmul.f32 0.020408163, %v1477_v39 }
 0x166   : >> { %v1448_v42 = vrot.slane %v1447_v36, 2  ;;  %v1460_v19 = vadd.f32 %v1459_v23, %v1458_v57  ;;  %v1601_v61 = vmul.f32 %v1570_v4, %v1492_v54 }
 0x168   : >> { %v1449_v33 = vadd.f32 %v1448_v42, %v1447_v36  ;;  %v1461_v34 = vrot.slane %v1460_v19, 2  ;;  %v1630_v49 = vsel %vm1602_vm1, %v1601_v61, 0.0 }
 0x16a   : >> { %v1450_v58 = vrot.slane %v1449_v33, 1  ;;  %v1462_v38 = vadd.f32 %v1461_v34, %v1460_v19 }
 0x16c   : >> { %v1451_v41 = vadd.f32 %v1450_v58, %v1449_v33  ;;  %v1463_v12 = vrot.slane %v1462_v38, 1 }
 0x16e   : >> { %v1464_v50 = vadd.f32 %v1463_v12, %v1462_v38  ;;  %v1490_v27 = vmul.f32 0.020408163, %v1451_v41 }
 0x170   : >> { %v1491_v56 = vmul.f32 0.020408163, %v1464_v50  ;;  %v1599_v43 = vmul.f32 %v1563_v40, %v1490_v27 }
 0x172   : >> { %v1600_v20 = vmul.f32 %v1571_v53, %v1491_v56  ;;  %v1626_v62 = vsel %vm1602_vm1, %v1599_v43, 0.0 }
 0x173   : >> { %v1627_v1 = vadd.f32 %v1626_v62, %v1625_v59 }
 0x174   : >> { %v1628_v24 = vsel %vm1602_vm1, %v1600_v20, 0.0 }
 0x175   : >> { %v1629_v60 = vadd.f32 %v1628_v24, %v1627_v1 }
 0x177   : >> { %v1631_v5 = vadd.f32 %v1630_v49, %v1629_v60 }
 0x179   : >> { %1632 = vadd.xlane.f32.xlu0 %v1631_v5 }
 0x201   : > { %172 = sbr.rel (!%p170_p4) target bundleno = 15 (0xf), region = 71 }
 0x202   : >> { %v1633_v7 = vpop.xlane.xlu0 %1632 }
 0x203   : >> { %v1634_v8 = vadd.f32 %v1972_v0, %v1633_v7  }
 0x205   : >> { %v2481_v0 = vmov %v1634_v8  ;;  %v1641_v13 = vrot.slane (%p170_p4), %v1634_v8, %v1640_v11 }
 0x207   : > { %1644 = vst.msk [vmem:[%s166_s17] sm:$0x1] %vm1643_vm2, %v1641_v13 }
 0x208 PF: > { %s13_s12 = sadd.s32 1, %s1968_s12  }
 0x209   : > { %p10_p5 = scmp.ge.s32.totalorder %s13_s12, 4  }
 0x20b   :  { %12 = sbr.rel (!%p10_p5) target bundleno = 1 (0x1), region = 82 }

</bundles_post_ra>
